<compile_context>
chip_gen: v6e
topology: v6e:2x2x1
jax: 0.10.0
libtpu: 0.0.40
codegen_flags: <defaults>
</compile_context>

<pallas_src>
import jax
import jax.numpy as jnp
from jax.experimental import pallas as pl
from jax.experimental.pallas import tpu as pltpu

# ----------------------------- hyper-params ---------------------------------
# latent_dim=8, layer_sizes="64,32" (reversed -> [32, 64]),
# embedding_sizes=[(10,4),(5,3)] -> 7, cont_vars -> 5, batch_norm=True
LATENT_DIM = 8
H1, H2 = 32, 64
OUT_DIM = (4 + 3) + 5          # = 12
PAD = 128                      # lane-dense padded hidden width
BN_EPS = 1e-5
LEAKY_SLOPE = 0.1

BATCH = 256                    # example batch (multiple of 8)


# ------------------------------- kernel --------------------------------------
def decoder_kernel(z_ref, w1_ref, b1_ref, g1_ref, be1_ref,
                   w2_ref, b2_ref, g2_ref, be2_ref,
                   w3_ref, b3_ref, out_ref):
    """Fused Linear->BN->LeakyReLU x2 -> Linear for the whole batch."""
    inv_b = 1.0 / z_ref.shape[0]

    def layer(x, w_ref, b_ref, g_ref, be_ref):
        h = jnp.dot(x, w_ref[...], preferred_element_type=jnp.float32) + b_ref[...]
        # Full-batch BatchNorm (train mode, biased variance), two-pass form:
        # mean first, then centered sum-of-squares (avoids E[x^2]-E[x]^2
        # cancellation).  Padded columns have gamma=beta=0 -> stay exactly 0.
        mean = jnp.sum(h, axis=0, keepdims=True) * inv_b
        c = h - mean
        var = jnp.sum(c * c, axis=0, keepdims=True) * inv_b
        scale = g_ref[...] * jax.lax.rsqrt(var + BN_EPS)
        h = c * scale + be_ref[...]
        return jnp.where(h > 0, h, LEAKY_SLOPE * h)         # LeakyReLU(0.1)

    a1 = layer(z_ref[...].astype(jnp.float32), w1_ref, b1_ref, g1_ref, be1_ref)
    a2 = layer(a1, w2_ref, b2_ref, g2_ref, be2_ref)
    out_ref[...] = (jnp.dot(a2, w3_ref[...], preferred_element_type=jnp.float32)
                    + b3_ref[...]).astype(out_ref.dtype)


# ------------------------------- wrapper --------------------------------------
@jax.jit
def decoder_forward(z, pp):
    batch, zdim = z.shape
    assert batch % 8 == 0, "batch must be a multiple of 8 (sublane tiling)"

    const = lambda shape: pl.BlockSpec(shape, lambda i: (0, 0))

    return pl.pallas_call(
        decoder_kernel,
        out_shape=jax.ShapeDtypeStruct((batch, OUT_DIM), jnp.float32),
        grid=(1,),
        in_specs=[
            const((batch, zdim)),               # z (whole array, one DMA)
            const((LATENT_DIM, PAD)), const((1, PAD)),   # w1, b1
            const((1, PAD)), const((1, PAD)),            # gamma1, beta1
            const((PAD, PAD)), const((1, PAD)),          # w2, b2
            const((1, PAD)), const((1, PAD)),            # gamma2, beta2
            const((PAD, OUT_DIM)), const((1, OUT_DIM)),  # w3, b3
        ],
        out_specs=const((batch, OUT_DIM)),
        compiler_params=pltpu.CompilerParams(
            dimension_semantics=("arbitrary",)),
    )(z, pp["w1"], pp["b1"], pp["g1"], pp["be1"],
      pp["w2"], pp["b2"], pp["g2"], pp["be2"], pp["w3"], pp["b3"])


# --------------------------- parameter init ----------------------------------
def init_params(key):
    ks = jax.random.split(key, 8)

    def linear(kw, kb, din, dout):
        bound = 1.0 / jnp.sqrt(din)
        w = jax.random.uniform(kw, (din, dout), jnp.float32, -bound, bound)
        b = jax.random.uniform(kb, (1, dout), jnp.float32, -bound, bound)
        return w, b

    w1, b1 = linear(ks[0], ks[1], LATENT_DIM, H1)
    w2, b2 = linear(ks[2], ks[3], H1, H2)
    w3, b3 = linear(ks[4], ks[5], H2, OUT_DIM)
    # BatchNorm affine params (torch init gamma=1, beta=0) — perturb layer 1
    # deterministically so the affine path is exercised.
    g1 = 1.0 + 0.1 * jax.random.normal(ks[6], (1, H1), jnp.float32)
    be1 = 0.1 * jax.random.normal(ks[7], (1, H1), jnp.float32)
    g2 = jnp.ones((1, H2), jnp.float32)
    be2 = jnp.zeros((1, H2), jnp.float32)
    return dict(w1=w1, b1=b1, g1=g1, be1=be1,
                w2=w2, b2=b2, g2=g2, be2=be2,
                w3=w3, b3=b3)


def pad_params(p):
    """Zero-pad hidden feature dims to 128 lanes (padded gamma/beta/bias = 0).

    The output projection keeps its logical width (OUT_DIM): only its input
    rows are padded, so no trailing slice is needed on the kernel output.
    """
    def pad2(a, rows, cols):
        out = jnp.zeros((rows, cols), a.dtype)
        return out.at[:a.shape[0], :a.shape[1]].set(a)

    return dict(
        w1=pad2(p["w1"], LATENT_DIM, PAD), b1=pad2(p["b1"], 1, PAD),
        g1=pad2(p["g1"], 1, PAD), be1=pad2(p["be1"], 1, PAD),
        w2=pad2(p["w2"], PAD, PAD), b2=pad2(p["b2"], 1, PAD),
        g2=pad2(p["g2"], 1, PAD), be2=pad2(p["be2"], 1, PAD),
        w3=pad2(p["w3"], PAD, OUT_DIM), b3=p["b3"],
    )


# --------------------------- pure-JAX reference ------------------------------
def decoder_ref(z, p):
    def layer(x, w, b, g, be):
        h = x @ w + b
        mean = jnp.mean(h, axis=0, keepdims=True)
        var = jnp.mean((h - mean) ** 2, axis=0, keepdims=True)   # biased var
        h = (h - mean) / jnp.sqrt(var + BN_EPS) * g + be
        return jnp.where(h > 0, h, LEAKY_SLOPE * h)

    x = layer(z, p["w1"], p["b1"], p["g1"], p["be1"])
    x = layer(x, p["w2"], p["b2"], p["g2"], p["be2"])
    return x @ p["w3"] + p["b3"]


# ---------------------------------- main --------------------------------------
if __name__ == "__main__":
    key = jax.random.PRNGKey(0)
    kz, kp = jax.random.split(key)
    z = jax.random.normal(kz, (BATCH, LATENT_DIM), jnp.float32)
    params = init_params(kp)
    padded = pad_params(params)

    out = decoder_forward(z, padded)
    out = jax.block_until_ready(out)

    ref = decoder_ref(z, params)
    assert out.shape == (BATCH, OUT_DIM), out.shape
    max_err = float(jnp.max(jnp.abs(out - ref)))
    assert jnp.allclose(out, ref, atol=1e-3, rtol=1e-3), (
        "mismatch vs reference: max abs err = %e" % max_err)

    print("KERNEL_OK")
</pallas_src>

<mosaic_0001>
module attributes {stable_mosaic.version = 11 : i64} {
  func.func @decoder_kernel(%arg0: i32, %arg1: memref<256x8xf32, #tpu.memory_space<vmem>>, %arg2: memref<8x128xf32, #tpu.memory_space<vmem>>, %arg3: memref<1x128xf32, #tpu.memory_space<vmem>>, %arg4: memref<1x128xf32, #tpu.memory_space<vmem>>, %arg5: memref<1x128xf32, #tpu.memory_space<vmem>>, %arg6: memref<128x128xf32, #tpu.memory_space<vmem>>, %arg7: memref<1x128xf32, #tpu.memory_space<vmem>>, %arg8: memref<1x128xf32, #tpu.memory_space<vmem>>, %arg9: memref<1x128xf32, #tpu.memory_space<vmem>>, %arg10: memref<128x12xf32, #tpu.memory_space<vmem>>, %arg11: memref<1x12xf32, #tpu.memory_space<vmem>>, %arg12: memref<256x12xf32, #tpu.memory_space<vmem>>) attributes {dimension_semantics = [#tpu.dimension_semantics<arbitrary>], iteration_bounds = array<i64: 1>, scalar_prefetch = 0 : i64, scratch_operands = 0 : i64, tpu.core_type = #tpu.core_type<tc>, window_params = [{pipeline_mode = #tpu.pipeline_mode<synchronous>, transform_indices = @transform_0, window_bounds = array<i64: 256, 8>}, {pipeline_mode = #tpu.pipeline_mode<synchronous>, transform_indices = @transform_1, window_bounds = array<i64: 8, 128>}, {pipeline_mode = #tpu.pipeline_mode<synchronous>, transform_indices = @transform_2, window_bounds = array<i64: 1, 128>}, {pipeline_mode = #tpu.pipeline_mode<synchronous>, transform_indices = @transform_3, window_bounds = array<i64: 1, 128>}, {pipeline_mode = #tpu.pipeline_mode<synchronous>, transform_indices = @transform_4, window_bounds = array<i64: 1, 128>}, {pipeline_mode = #tpu.pipeline_mode<synchronous>, transform_indices = @transform_5, window_bounds = array<i64: 128, 128>}, {pipeline_mode = #tpu.pipeline_mode<synchronous>, transform_indices = @transform_6, window_bounds = array<i64: 1, 128>}, {pipeline_mode = #tpu.pipeline_mode<synchronous>, transform_indices = @transform_7, window_bounds = array<i64: 1, 128>}, {pipeline_mode = #tpu.pipeline_mode<synchronous>, transform_indices = @transform_8, window_bounds = array<i64: 1, 128>}, {pipeline_mode = #tpu.pipeline_mode<synchronous>, transform_indices = @transform_9, window_bounds = array<i64: 128, 12>}, {pipeline_mode = #tpu.pipeline_mode<synchronous>, transform_indices = @transform_10, window_bounds = array<i64: 1, 12>}, {pipeline_mode = #tpu.pipeline_mode<synchronous>, transform_indices = @transform_11, window_bounds = array<i64: 256, 12>}]} {
    %c0 = arith.constant 0 : index
    %c0_0 = arith.constant 0 : index
    %0 = vector.load %arg1[%c0, %c0_0] : memref<256x8xf32, #tpu.memory_space<vmem>>, vector<256x8xf32>
    %c0_1 = arith.constant 0 : index
    %c0_2 = arith.constant 0 : index
    %1 = vector.load %arg2[%c0_1, %c0_2] : memref<8x128xf32, #tpu.memory_space<vmem>>, vector<8x128xf32>
    %cst = arith.constant dense<0.000000e+00> : vector<256x128xf32>
    %2 = tpu.matmul %0, %1, %cst {dimension_numbers = #tpu.dot_dimension_numbers<[1], [0], [0], [1], [0, 0, 1, 1], [], []>} : vector<256x8xf32>, vector<8x128xf32>, vector<256x128xf32> -> vector<256x128xf32>
    %c0_3 = arith.constant 0 : index
    %c0_4 = arith.constant 0 : index
    %3 = vector.load %arg3[%c0_3, %c0_4] : memref<1x128xf32, #tpu.memory_space<vmem>>, vector<1x128xf32>
    %4 = vector.broadcast %3 : vector<1x128xf32> to vector<256x128xf32>
    %5 = arith.addf %2, %4 : vector<256x128xf32>
    %cst_5 = arith.constant dense<0.000000e+00> : vector<128xf32>
    %6 = vector.multi_reduction <add>, %5, %cst_5 [0] : vector<256x128xf32> to vector<128xf32>
    %7 = vector.shape_cast %6 : vector<128xf32> to vector<1x128xf32>
    %cst_6 = arith.constant 3.906250e-03 : f32
    %8 = vector.broadcast %cst_6 : f32 to vector<1x128xf32>
    %9 = arith.mulf %7, %8 : vector<1x128xf32>
    %10 = vector.broadcast %9 : vector<1x128xf32> to vector<256x128xf32>
    %11 = arith.subf %5, %10 : vector<256x128xf32>
    %12 = arith.mulf %11, %11 : vector<256x128xf32>
    %cst_7 = arith.constant dense<0.000000e+00> : vector<128xf32>
    %13 = vector.multi_reduction <add>, %12, %cst_7 [0] : vector<256x128xf32> to vector<128xf32>
    %14 = vector.shape_cast %13 : vector<128xf32> to vector<1x128xf32>
    %cst_8 = arith.constant 3.906250e-03 : f32
    %15 = vector.broadcast %cst_8 : f32 to vector<1x128xf32>
    %16 = arith.mulf %14, %15 : vector<1x128xf32>
    %c0_9 = arith.constant 0 : index
    %c0_10 = arith.constant 0 : index
    %17 = vector.load %arg4[%c0_9, %c0_10] : memref<1x128xf32, #tpu.memory_space<vmem>>, vector<1x128xf32>
    %cst_11 = arith.constant 9.99999974E-6 : f32
    %18 = vector.broadcast %cst_11 : f32 to vector<1x128xf32>
    %19 = arith.addf %16, %18 : vector<1x128xf32>
    %20 = math.rsqrt %19 : vector<1x128xf32>
    %21 = arith.mulf %17, %20 : vector<1x128xf32>
    %22 = vector.broadcast %21 : vector<1x128xf32> to vector<256x128xf32>
    %23 = arith.mulf %11, %22 : vector<256x128xf32>
    %c0_12 = arith.constant 0 : index
    %c0_13 = arith.constant 0 : index
    %24 = vector.load %arg5[%c0_12, %c0_13] : memref<1x128xf32, #tpu.memory_space<vmem>>, vector<1x128xf32>
    %25 = vector.broadcast %24 : vector<1x128xf32> to vector<256x128xf32>
    %26 = arith.addf %23, %25 : vector<256x128xf32>
    %cst_14 = arith.constant 0.000000e+00 : f32
    %27 = vector.broadcast %cst_14 : f32 to vector<256x128xf32>
    %28 = arith.cmpf ogt, %26, %27 : vector<256x128xf32>
    %cst_15 = arith.constant 1.000000e-01 : f32
    %29 = vector.broadcast %cst_15 : f32 to vector<256x128xf32>
    %30 = arith.mulf %29, %26 : vector<256x128xf32>
    %31 = arith.select %28, %26, %30 : vector<256x128xi1>, vector<256x128xf32>
    %c0_16 = arith.constant 0 : index
    %c0_17 = arith.constant 0 : index
    %32 = vector.load %arg6[%c0_16, %c0_17] : memref<128x128xf32, #tpu.memory_space<vmem>>, vector<128x128xf32>
    %cst_18 = arith.constant dense<0.000000e+00> : vector<256x128xf32>
    %33 = tpu.matmul %31, %32, %cst_18 {dimension_numbers = #tpu.dot_dimension_numbers<[1], [0], [0], [1], [0, 0, 1, 1], [], []>} : vector<256x128xf32>, vector<128x128xf32>, vector<256x128xf32> -> vector<256x128xf32>
    %c0_19 = arith.constant 0 : index
    %c0_20 = arith.constant 0 : index
    %34 = vector.load %arg7[%c0_19, %c0_20] : memref<1x128xf32, #tpu.memory_space<vmem>>, vector<1x128xf32>
    %35 = vector.broadcast %34 : vector<1x128xf32> to vector<256x128xf32>
    %36 = arith.addf %33, %35 : vector<256x128xf32>
    %cst_21 = arith.constant dense<0.000000e+00> : vector<128xf32>
    %37 = vector.multi_reduction <add>, %36, %cst_21 [0] : vector<256x128xf32> to vector<128xf32>
    %38 = vector.shape_cast %37 : vector<128xf32> to vector<1x128xf32>
    %cst_22 = arith.constant 3.906250e-03 : f32
    %39 = vector.broadcast %cst_22 : f32 to vector<1x128xf32>
    %40 = arith.mulf %38, %39 : vector<1x128xf32>
    %41 = vector.broadcast %40 : vector<1x128xf32> to vector<256x128xf32>
    %42 = arith.subf %36, %41 : vector<256x128xf32>
    %43 = arith.mulf %42, %42 : vector<256x128xf32>
    %cst_23 = arith.constant dense<0.000000e+00> : vector<128xf32>
    %44 = vector.multi_reduction <add>, %43, %cst_23 [0] : vector<256x128xf32> to vector<128xf32>
    %45 = vector.shape_cast %44 : vector<128xf32> to vector<1x128xf32>
    %cst_24 = arith.constant 3.906250e-03 : f32
    %46 = vector.broadcast %cst_24 : f32 to vector<1x128xf32>
    %47 = arith.mulf %45, %46 : vector<1x128xf32>
    %c0_25 = arith.constant 0 : index
    %c0_26 = arith.constant 0 : index
    %48 = vector.load %arg8[%c0_25, %c0_26] : memref<1x128xf32, #tpu.memory_space<vmem>>, vector<1x128xf32>
    %cst_27 = arith.constant 9.99999974E-6 : f32
    %49 = vector.broadcast %cst_27 : f32 to vector<1x128xf32>
    %50 = arith.addf %47, %49 : vector<1x128xf32>
    %51 = math.rsqrt %50 : vector<1x128xf32>
    %52 = arith.mulf %48, %51 : vector<1x128xf32>
    %53 = vector.broadcast %52 : vector<1x128xf32> to vector<256x128xf32>
    %54 = arith.mulf %42, %53 : vector<256x128xf32>
    %c0_28 = arith.constant 0 : index
    %c0_29 = arith.constant 0 : index
    %55 = vector.load %arg9[%c0_28, %c0_29] : memref<1x128xf32, #tpu.memory_space<vmem>>, vector<1x128xf32>
    %56 = vector.broadcast %55 : vector<1x128xf32> to vector<256x128xf32>
    %57 = arith.addf %54, %56 : vector<256x128xf32>
    %cst_30 = arith.constant 0.000000e+00 : f32
    %58 = vector.broadcast %cst_30 : f32 to vector<256x128xf32>
    %59 = arith.cmpf ogt, %57, %58 : vector<256x128xf32>
    %cst_31 = arith.constant 1.000000e-01 : f32
    %60 = vector.broadcast %cst_31 : f32 to vector<256x128xf32>
    %61 = arith.mulf %60, %57 : vector<256x128xf32>
    %62 = arith.select %59, %57, %61 : vector<256x128xi1>, vector<256x128xf32>
    %c0_32 = arith.constant 0 : index
    %c0_33 = arith.constant 0 : index
    %63 = vector.load %arg10[%c0_32, %c0_33] : memref<128x12xf32, #tpu.memory_space<vmem>>, vector<128x12xf32>
    %cst_34 = arith.constant dense<0.000000e+00> : vector<256x12xf32>
    %64 = tpu.matmul %62, %63, %cst_34 {dimension_numbers = #tpu.dot_dimension_numbers<[1], [0], [0], [1], [0, 0, 1, 1], [], []>} : vector<256x128xf32>, vector<128x12xf32>, vector<256x12xf32> -> vector<256x12xf32>
    %c0_35 = arith.constant 0 : index
    %c0_36 = arith.constant 0 : index
    %65 = vector.load %arg11[%c0_35, %c0_36] : memref<1x12xf32, #tpu.memory_space<vmem>>, vector<1x12xf32>
    %66 = vector.broadcast %65 : vector<1x12xf32> to vector<256x12xf32>
    %67 = arith.addf %64, %66 : vector<256x12xf32>
    %c0_37 = arith.constant 0 : index
    %c0_38 = arith.constant 0 : index
    %68 = vector.load %arg12[%c0_37, %c0_38] : memref<256x12xf32, #tpu.memory_space<vmem>>, vector<256x12xf32>
    tpu.vector_store %arg12[%c0_37, %c0_38], %67 {strides = array<i32>} : memref<256x12xf32, #tpu.memory_space<vmem>>, vector<256x12xf32>,
    return
  }
  func.func @transform_0(%arg0: i32) -> (i32, i32) {
    %c0_i32 = arith.constant 0 : i32
    %c0_i32_0 = arith.constant 0 : i32
    %c0_i32_1 = arith.constant 0 : i32
    return %c0_i32, %c0_i32_0 : i32, i32
  }
  func.func @transform_1(%arg0: i32) -> (i32, i32) {
    %c0_i32 = arith.constant 0 : i32
    %c0_i32_0 = arith.constant 0 : i32
    %c0_i32_1 = arith.constant 0 : i32
    return %c0_i32, %c0_i32_0 : i32, i32
  }
  func.func @transform_2(%arg0: i32) -> (i32, i32) {
    %c0_i32 = arith.constant 0 : i32
    %c0_i32_0 = arith.constant 0 : i32
    %c0_i32_1 = arith.constant 0 : i32
    return %c0_i32, %c0_i32_0 : i32, i32
  }
  func.func @transform_3(%arg0: i32) -> (i32, i32) {
    %c0_i32 = arith.constant 0 : i32
    %c0_i32_0 = arith.constant 0 : i32
    %c0_i32_1 = arith.constant 0 : i32
    return %c0_i32, %c0_i32_0 : i32, i32
  }
  func.func @transform_4(%arg0: i32) -> (i32, i32) {
    %c0_i32 = arith.constant 0 : i32
    %c0_i32_0 = arith.constant 0 : i32
    %c0_i32_1 = arith.constant 0 : i32
    return %c0_i32, %c0_i32_0 : i32, i32
  }
  func.func @transform_5(%arg0: i32) -> (i32, i32) {
    %c0_i32 = arith.constant 0 : i32
    %c0_i32_0 = arith.constant 0 : i32
    %c0_i32_1 = arith.constant 0 : i32
    return %c0_i32, %c0_i32_0 : i32, i32
  }
  func.func @transform_6(%arg0: i32) -> (i32, i32) {
    %c0_i32 = arith.constant 0 : i32
    %c0_i32_0 = arith.constant 0 : i32
    %c0_i32_1 = arith.constant 0 : i32
    return %c0_i32, %c0_i32_0 : i32, i32
  }
  func.func @transform_7(%arg0: i32) -> (i32, i32) {
    %c0_i32 = arith.constant 0 : i32
    %c0_i32_0 = arith.constant 0 : i32
    %c0_i32_1 = arith.constant 0 : i32
    return %c0_i32, %c0_i32_0 : i32, i32
  }
  func.func @transform_8(%arg0: i32) -> (i32, i32) {
    %c0_i32 = arith.constant 0 : i32
    %c0_i32_0 = arith.constant 0 : i32
    %c0_i32_1 = arith.constant 0 : i32
    return %c0_i32, %c0_i32_0 : i32, i32
  }
  func.func @transform_9(%arg0: i32) -> (i32, i32) {
    %c0_i32 = arith.constant 0 : i32
    %c0_i32_0 = arith.constant 0 : i32
    %c0_i32_1 = arith.constant 0 : i32
    return %c0_i32, %c0_i32_0 : i32, i32
  }
  func.func @transform_10(%arg0: i32) -> (i32, i32) {
    %c0_i32 = arith.constant 0 : i32
    %c0_i32_0 = arith.constant 0 : i32
    %c0_i32_1 = arith.constant 0 : i32
    return %c0_i32, %c0_i32_0 : i32, i32
  }
  func.func @transform_11(%arg0: i32) -> (i32, i32) {
    %c0_i32 = arith.constant 0 : i32
    %c0_i32_0 = arith.constant 0 : i32
    %c0_i32_1 = arith.constant 0 : i32
    return %c0_i32, %c0_i32_0 : i32, i32
  }
}

</mosaic_0001>

<bundles_post_ra>
// kernel: decoder_forward.1
= control target key start
LH: loop header
LB: loop body
LE: loop exit
PB: predicated region body
PF: predicated region fallthrough
CT: control target
= control target key end

     0   :  { %vm78_vm0 = vcmask 64512   ;;  %s3274_s1 = inlined_call_operand.vmem [shape: f32[8,128], index: 1, kind: input, shape index: {}]   ;;  %s3275_s0 = inlined_call_operand.vmem [shape: f32[256,8], index: 0, kind: input, shape index: {}]   ;;  %s3276_s2 = inlined_call_operand.vmem [shape: f32[1,128], index: 2, kind: input, shape index: {}]   ;;  %s3277_s5 = inlined_call_operand.vmem [shape: f32[128,128], index: 5, kind: input, shape index: {}]   ;;  %s3278_s3 = inlined_call_operand.vmem [shape: f32[1,128], index: 3, kind: input, shape index: {}]   ;;  %s3279_s4 = inlined_call_operand.vmem [shape: f32[1,128], index: 4, kind: input, shape index: {}]   ;;  %s3280_s6 = inlined_call_operand.vmem [shape: f32[1,128], index: 6, kind: input, shape index: {}]   ;;  %s3281_s9 = inlined_call_operand.vmem [shape: f32[128,12], index: 9, kind: input, shape index: {}]   ;;  %s3282_s7 = inlined_call_operand.vmem [shape: f32[1,128], index: 7, kind: input, shape index: {}]   ;;  %s3283_s8 = inlined_call_operand.vmem [shape: f32[1,128], index: 8, kind: input, shape index: {}]   ;;  %s3284_s10 = inlined_call_operand.vmem [shape: f32[1,12], index: 10, kind: input, shape index: {}]   ;;  %s3285_s11 = inlined_call_operand.vmem [shape: f32[256,12], index: 11, kind: output, shape index: {}]  }
   0x1   :  { %v70_v0 = vld [vmem:[%s3274_s1] sm:$0xff]  ;;  %v39_v2 = vld [vmem:[%s3275_s0 + $0x8] sm:$0xff]  ;;  %v40_v3 = vld [vmem:[%s3275_s0 + $0x10] sm:$0xff] }
   0x2   :  { %v38_v1 = vld [vmem:[%s3275_s0] sm:$0xff]  ;;  %1733 = vmatprep.subr.mxu0 %v70_v0  ;;  %1943 = vmatprep.subr.mxu1 %v70_v0  ;;  %v41_v4 = vld [vmem:[%s3275_s0 + $0x18] sm:$0xff]  ;;  %v55_v7 = vld [vmem:[%s3275_s0 + $0x88] sm:$0xff] }
   0x3   :  { %1735 = vmatprep.mubr.msk.f32.mxu0 %vm78_vm0, %v38_v1  ;;  %1734 = vmatpush3.msra.mxu0 %v70_v0  ;;  %v42_v5 = vld [vmem:[%s3275_s0 + $0x20] sm:$0xff]  ;;  %v56_v8 = vld [vmem:[%s3275_s0 + $0x90] sm:$0xff]  ;;  %v43_v9 = vld [vmem:[%s3275_s0 + $0x28] sm:$0xff] }
   0x4   :  { %1736 = vmatmul.mubr.msk.f32.vlgmr.msra.gmra.mxu0 %vm78_vm0, %v39_v2  ;;  %1944 = vmatpush3.msra.mxu1 %v70_v0  ;;  %v54_v6 = vld [vmem:[%s3275_s0 + $0x80] sm:$0xff]  ;;  %v57_v10 = vld [vmem:[%s3275_s0 + $0x98] sm:$0xff]  ;;  %v44_v11 = vld [vmem:[%s3275_s0 + $0x30] sm:$0xff] }
   0x5   :  { %1738 = vmatprep.mubr.msk.f32.mxu0 %vm78_vm0, %v40_v3  ;;  %1759 = vmatprep.mubr.msk.f32.mxu1 %vm78_vm0, %v54_v6  ;;  %v58_v12 = vld [vmem:[%s3275_s0 + $0xa0] sm:$0xff]  ;;  %v45_v13 = vld [vmem:[%s3275_s0 + $0x38] sm:$0xff]  ;;  %v59_v14 = vld [vmem:[%s3275_s0 + $0xa8] sm:$0xff] }
   0x6   :  { %1760 = vmatmul.mubr.msk.f32.vlgmr.msra.gmra.mxu1 %vm78_vm0, %v55_v7  ;;  %v46_v15 = vld [vmem:[%s3275_s0 + $0x40] sm:$0xff]  ;;  %v60_v16 = vld [vmem:[%s3275_s0 + $0xb0] sm:$0xff]  ;;  %v47_v17 = vld [vmem:[%s3275_s0 + $0x48] sm:$0xff] }
   0x7   :  { %1762 = vmatprep.mubr.msk.f32.mxu1 %vm78_vm0, %v56_v8  ;;  %v61_v18 = vld [vmem:[%s3275_s0 + $0xb8] sm:$0xff]  ;;  %v48_v19 = vld [vmem:[%s3275_s0 + $0x50] sm:$0xff]  ;;  %v62_v20 = vld [vmem:[%s3275_s0 + $0xc0] sm:$0xff] }
   0x8   :  { %1739 = vmatmul.mubr.msk.f32.gmra.mxu0 %vm78_vm0, %v41_v4  ;;  %v49_v21 = vld [vmem:[%s3275_s0 + $0x58] sm:$0xff]  ;;  %v63_v22 = vld [vmem:[%s3275_s0 + $0xc8] sm:$0xff]  ;;  %v50_v23 = vld [vmem:[%s3275_s0 + $0x60] sm:$0xff] }
   0x9   :  { %1741 = vmatprep.mubr.msk.f32.mxu0 %vm78_vm0, %v42_v5  ;;  %v64_v24 = vld [vmem:[%s3275_s0 + $0xd0] sm:$0xff]  ;;  %v51_v25 = vld [vmem:[%s3275_s0 + $0x68] sm:$0xff]  ;;  %v65_v26 = vld [vmem:[%s3275_s0 + $0xd8] sm:$0xff] }
   0xa   :  { %1763 = vmatmul.mubr.msk.f32.gmra.mxu1 %vm78_vm0, %v57_v10  ;;  %v52_v27 = vld [vmem:[%s3275_s0 + $0x70] sm:$0xff]  ;;  %v66_v28 = vld [vmem:[%s3275_s0 + $0xe0] sm:$0xff]  ;;  %v53_v29 = vld [vmem:[%s3275_s0 + $0x78] sm:$0xff] }
   0xb   :  { %1765 = vmatprep.mubr.msk.f32.mxu1 %vm78_vm0, %v58_v12  ;;  %v67_v30 = vld [vmem:[%s3275_s0 + $0xe8] sm:$0xff]  ;;  %v68_v31 = vld [vmem:[%s3275_s0 + $0xf0] sm:$0xff]  ;;  %v69_v32 = vld [vmem:[%s3275_s0 + $0xf8] sm:$0xff] }
   0xc   :  { %1742 = vmatmul.mubr.msk.f32.gmra.mxu0 %vm78_vm0, %v43_v9  ;;  %v2143_v34 = vld [vmem:[%s3276_s2] ss:$0 sm:$0xff] }
   0xd   :  { %1744 = vmatprep.mubr.msk.f32.mxu0 %vm78_vm0, %v44_v11 }
   0xe   :  { %1766 = vmatmul.mubr.msk.f32.gmra.mxu1 %vm78_vm0, %v59_v14 }
   0xf   :  { %1768 = vmatprep.mubr.msk.f32.mxu1 %vm78_vm0, %v60_v16 }
  0x10   :  { %1745 = vmatmul.mubr.msk.f32.gmra.mxu0 %vm78_vm0, %v45_v13 }
  0x11   :  { %1747 = vmatprep.mubr.msk.f32.mxu0 %vm78_vm0, %v46_v15 }
  0x12   :  { %1769 = vmatmul.mubr.msk.f32.gmra.mxu1 %vm78_vm0, %v61_v18 }
  0x13   :  { %1771 = vmatprep.mubr.msk.f32.mxu1 %vm78_vm0, %v62_v20 }
  0x14   :  { %1748 = vmatmul.mubr.msk.f32.gmra.mxu0 %vm78_vm0, %v47_v17 }
  0x15   :  { %1750 = vmatprep.mubr.msk.f32.mxu0 %vm78_vm0, %v48_v19 }
  0x16   :  { %1772 = vmatmul.mubr.msk.f32.gmra.mxu1 %vm78_vm0, %v63_v22 }
  0x17   :  { %1774 = vmatprep.mubr.msk.f32.mxu1 %vm78_vm0, %v64_v24 }
  0x18   :  { %1751 = vmatmul.mubr.msk.f32.gmra.mxu0 %vm78_vm0, %v49_v21 }
  0x19   :  { %1753 = vmatprep.mubr.msk.f32.mxu0 %vm78_vm0, %v50_v23 }
  0x1a   :  { %1775 = vmatmul.mubr.msk.f32.gmra.mxu1 %vm78_vm0, %v65_v26 }
  0x1b   :  { %1777 = vmatprep.mubr.msk.f32.mxu1 %vm78_vm0, %v66_v28 }
  0x1c   :  { %1754 = vmatmul.mubr.msk.f32.gmra.mxu0 %vm78_vm0, %v51_v25 }
  0x1d   :  { %1756 = vmatprep.mubr.msk.f32.mxu0 %vm78_vm0, %v52_v27 }
  0x1e   :  { %1778 = vmatmul.mubr.msk.f32.gmra.mxu1 %vm78_vm0, %v67_v30 }
  0x1f   :  { %1780 = vmatprep.mubr.msk.f32.mxu1 %vm78_vm0, %v68_v31 }
  0x20   :  { %1757 = vmatmul.mubr.msk.f32.gmra.mxu0 %vm78_vm0, %v53_v29 }
  0x22   :  { %1781 = vmatmul.mubr.msk.f32.gmra.mxu1 %vm78_vm0, %v69_v32 }
  0xc4   :  { %v1737_v33 = vpop.f32.mrf.mxu0 }
  0xc5   :  { %v2149_v39 = vadd.f32 %v1737_v33, %v2143_v34 }
  0xc6   :  { %v241_v35 = vpop.f32.mrf.mxu0  ;;  %v1761_v38 = vpop.f32.mrf.mxu1 }
  0xc7   :  { %v2146_v36 = vadd.f32 %v2143_v34, %v241_v35  ;;  %v2213_v28 = vadd.f32 %v1761_v38, %v2143_v34 }
  0xc8   :  { %v1740_v37 = vpop.f32.mrf.mxu0  ;;  %v321_v41 = vpop.f32.mrf.mxu1 }
  0xc9   :  { %v400_v42 = vadd.f32 %v2149_v39, %v2146_v36  ;;  %v2157_v46 = vadd.f32 %v1740_v37, %v2143_v34  ;;  %v2209_v25 = vadd.f32 %v2143_v34, %v321_v41 }
  0xca   :  { %v251_v40 = vpop.f32.mrf.mxu0  ;;  %v1764_v45 = vpop.f32.mrf.mxu1 }
  0xcb   :  { %v2154_v43 = vadd.f32 %v2143_v34, %v251_v40  ;;  %v2221_v33 = vadd.f32 %v1764_v45, %v2143_v34 }
  0xcc   :  { %v1743_v44 = vpop.f32.mrf.mxu0  ;;  %v331_v52 = vpop.f32.mrf.mxu1 }
  0xcd   :  { %v401_v47 = vadd.f32 %v400_v42, %v2154_v43  ;;  %v2165_v53 = vadd.f32 %v1743_v44, %v2143_v34  ;;  %v2217_v30 = vadd.f32 %v2143_v34, %v331_v52 }
  0xce   :  { %v261_v48 = vpop.f32.mrf.mxu0  ;;  %v1767_v59 = vpop.f32.mrf.mxu1 }
  0xcf   :  { %v2161_v49 = vadd.f32 %v2143_v34, %v261_v48  ;;  %v402_v50 = vadd.f32 %v401_v47, %v2157_v46  ;;  %v2229_v41 = vadd.f32 %v1767_v59, %v2143_v34 }
  0xd0   :  { %v1746_v51 = vpop.f32.mrf.mxu0  ;;  %v341_v2 = vpop.f32.mrf.mxu1 }
  0xd1   :  { %v403_v54 = vadd.f32 %v402_v50, %v2161_v49  ;;  %v2173_v60 = vadd.f32 %v1746_v51, %v2143_v34  ;;  %v2225_v37 = vadd.f32 %v2143_v34, %v341_v2  ;;  %v732_v51 = vld [vmem:[%s3277_s5 + $0x78] sm:$0xff] }
  0xd2   :  { %v271_v55 = vpop.f32.mrf.mxu0  ;;  %v1770_v9 = vpop.f32.mrf.mxu1  ;;  %1783 = vmatprep.subr.mxu1 %v732_v51 }
  0xd3   :  { %v2169_v56 = vadd.f32 %v2143_v34, %v271_v55  ;;  %v404_v57 = vadd.f32 %v403_v54, %v2165_v53  ;;  %v2237_v48 = vadd.f32 %v1770_v9, %v2143_v34  ;;  %1784 = vmatpush3.msra.mxu1 %v732_v51  ;;  %v731_v55 = vld [vmem:[%s3277_s5 + $0x70] sm:$0xff] }
  0xd4   :  { %v1749_v58 = vpop.f32.mrf.mxu0  ;;  %v351_v16 = vpop.f32.mrf.mxu1  ;;  %1785 = vmatprep.subr.mxu1 %v731_v55 }
  0xd5   :  { %v405_v61 = vadd.f32 %v404_v57, %v2169_v56  ;;  %v2181_v3 = vadd.f32 %v1749_v58, %v2143_v34  ;;  %v2233_v44 = vadd.f32 %v2143_v34, %v351_v16  ;;  %1786 = vmatpush3.msra.mxu1 %v731_v55  ;;  %v726_v16 = vld [vmem:[%s3277_s5 + $0x48] sm:$0xff] }
  0xd6   :  { %v281_v62 = vpop.f32.mrf.mxu0  ;;  %v1773_v22 = vpop.f32.mrf.mxu1 }
  0xd7   :  { %v2177_v63 = vadd.f32 %v2143_v34, %v281_v62  ;;  %v406_v0 = vadd.f32 %v405_v61, %v2173_v60  ;;  %v2251_v58 = vadd.f32 %v1773_v22, %v2143_v34  ;;  %v730_v61 = vld [vmem:[%s3277_s5 + $0x68] sm:$0xff] }
  0xd8   :  { %v1752_v1 = vpop.f32.mrf.mxu0  ;;  %v361_v27 = vpop.f32.mrf.mxu1  ;;  %1787 = vmatprep.subr.mxu1 %v730_v61 }
  0xd9   :  { %v407_v4 = vadd.f32 %v406_v0, %v2177_v63  ;;  %v2189_v10 = vadd.f32 %v1752_v1, %v2143_v34  ;;  %v2244_v52 = vadd.f32 %v2143_v34, %v361_v27  ;;  %1788 = vmatpush3.msra.mxu1 %v730_v61  ;;  %v729_v1 = vld [vmem:[%s3277_s5 + $0x60] sm:$0xff] }
  0xda   :  { %v291_v5 = vpop.f32.mrf.mxu0  ;;  %v1776_v32 = vpop.f32.mrf.mxu1  ;;  %1789 = vmatprep.subr.mxu1 %v729_v1 }
  0xdb   :  { %v2185_v6 = vadd.f32 %v2143_v34, %v291_v5  ;;  %v408_v7 = vadd.f32 %v407_v4, %v2181_v3  ;;  %v2265_v4 = vadd.f32 %v1776_v32, %v2143_v34  ;;  %1790 = vmatpush3.msra.mxu1 %v729_v1 }
  0xdc   :  { %v1755_v8 = vpop.f32.mrf.mxu0  ;;  %v371_v38 = vpop.f32.mrf.mxu1 }
  0xdd   :  { %v409_v11 = vadd.f32 %v408_v7, %v2185_v6  ;;  %v2197_v17 = vadd.f32 %v1755_v8, %v2143_v34  ;;  %v2258_v62 = vadd.f32 %v2143_v34, %v371_v38  ;;  %v728_v7 = vld [vmem:[%s3277_s5 + $0x58] sm:$0xff] }
  0xde   :  { %v301_v12 = vpop.f32.mrf.mxu0  ;;  %v1779_v45 = vpop.f32.mrf.mxu1  ;;  %1791 = vmatprep.subr.mxu1 %v728_v7  ;;  %v720_v38 = vld [vmem:[%s3277_s5 + $0x18] sm:$0xff] }
  0xdf   :  { %v2193_v13 = vadd.f32 %v2143_v34, %v301_v12  ;;  %v410_v14 = vadd.f32 %v409_v11, %v2189_v10  ;;  %1792 = vmatpush3.msra.mxu1 %v728_v7  ;;  %v727_v11 = vld [vmem:[%s3277_s5 + $0x50] sm:$0xff] }
  0xe0   :  { %v1758_v15 = vpop.f32.mrf.mxu0  ;;  %v381_v57 = vpop.f32.mrf.mxu1  ;;  %1793 = vmatprep.subr.mxu1 %v727_v11 }
  0xe1   :  { %v411_v18 = vadd.f32 %v410_v14, %v2193_v13  ;;  %v2205_v23 = vadd.f32 %v1758_v15, %v2143_v34  ;;  %v2272_v8 = vadd.f32 %v2143_v34, %v381_v57  ;;  %v2279_v14 = vadd.f32 %v1779_v45, %v2143_v34  ;;  %1794 = vmatpush3.msra.mxu1 %v727_v11  ;;  %v718_v45 = vld [vmem:[%s3277_s5 + $0x8] sm:$0xff] }
  0xe2   :  { %v311_v19 = vpop.f32.mrf.mxu0  ;;  %v1782_v2 = vpop.f32.mrf.mxu1  ;;  %1795 = vmatprep.subr.mxu1 %v726_v16 }
  0xe3   :  { %v2201_v20 = vadd.f32 %v2143_v34, %v311_v19  ;;  %v412_v21 = vadd.f32 %v411_v18, %v2197_v17  ;;  %1796 = vmatpush3.msra.mxu1 %v726_v16  ;;  %v2293_v22 = vadd.f32 %v1782_v2, %v2143_v34 }
  0xe4   :  { %v391_v12 = vpop.f32.mrf.mxu1 }
  0xe5   :  { %v413_v24 = vadd.f32 %v412_v21, %v2201_v20  ;;  %v2286_v18 = vadd.f32 %v2143_v34, %v391_v12  ;;  %v725_v21 = vld [vmem:[%s3277_s5 + $0x40] sm:$0xff]  ;;  %v722_v34 = vld [vmem:[%s3277_s5 + $0x28] sm:$0xff] }
  0xe6   :  { %1797 = vmatprep.subr.mxu1 %v725_v21 }
  0xe7   :  { %v414_v26 = vadd.f32 %v413_v24, %v2205_v23  ;;  %1798 = vmatpush3.msra.mxu1 %v725_v21 }
  0xe9   :  { %v415_v29 = vadd.f32 %v414_v26, %v2209_v25  ;;  %v724_v26 = vld [vmem:[%s3277_s5 + $0x38] sm:$0xff] }
  0xea   :  { %1799 = vmatprep.subr.mxu1 %v724_v26 }
  0xeb   :  { %v416_v31 = vadd.f32 %v415_v29, %v2213_v28  ;;  %1800 = vmatpush3.msra.mxu1 %v724_v26  ;;  %v723_v29 = vld [vmem:[%s3277_s5 + $0x30] sm:$0xff] }
  0xec   :  { %1801 = vmatprep.subr.mxu1 %v723_v29 }
  0xed   :  { %v417_v35 = vadd.f32 %v416_v31, %v2217_v30  ;;  %1802 = vmatpush3.msra.mxu1 %v723_v29 }
  0xee   :  { %1803 = vmatprep.subr.mxu1 %v722_v34 }
  0xef   :  { %v418_v40 = vadd.f32 %v417_v35, %v2221_v33  ;;  %1804 = vmatpush3.msra.mxu1 %v722_v34  ;;  %v721_v35 = vld [vmem:[%s3277_s5 + $0x20] sm:$0xff] }
  0xf0   :  { %1805 = vmatprep.subr.mxu1 %v721_v35 }
  0xf1   :  { %v419_v42 = vadd.f32 %v418_v40, %v2225_v37  ;;  %1806 = vmatpush3.msra.mxu1 %v721_v35 }
  0xf2   :  { %1807 = vmatprep.subr.mxu1 %v720_v38 }
  0xf3   :  { %v420_v47 = vadd.f32 %v419_v42, %v2229_v41  ;;  %1808 = vmatpush3.msra.mxu1 %v720_v38 }
  0xf5   :  { %v421_v50 = vadd.f32 %v420_v47, %v2233_v44  ;;  %v719_v47 = vld [vmem:[%s3277_s5 + $0x10] sm:$0xff] }
  0xf6   :  { %1809 = vmatprep.subr.mxu1 %v719_v47 }
  0xf7   :  { %v422_v54 = vadd.f32 %v421_v50, %v2237_v48  ;;  %1810 = vmatpush3.msra.mxu1 %v719_v47  ;;  %v717_v50 = vld [vmem:[%s3277_s5] sm:$0xff] }
  0xf8   :  { %1811 = vmatprep.subr.mxu1 %v718_v45 }
  0xf9   :  { %v423_v59 = vadd.f32 %v422_v54, %v2244_v52  ;;  %1812 = vmatpush3.msra.mxu1 %v718_v45 }
  0xfa   :  { %1813 = vmatprep.subr.mxu1 %v717_v50 }
  0xfb   :  { %v424_v0 = vadd.f32 %v423_v59, %v2251_v58  ;;  %1814 = vmatpush3.msra.mxu1 %v717_v50 }
  0xfd   :  { %v425_v5 = vadd.f32 %v424_v0, %v2258_v62 }
  0xff   :  { %v426_v9 = vadd.f32 %v425_v5, %v2265_v4 }
 0x101   :  { %v427_v15 = vadd.f32 %v426_v9, %v2272_v8 }
 0x103   :  { %v428_v19 = vadd.f32 %v427_v15, %v2279_v14 }
 0x105   :  { %v429_v24 = vadd.f32 %v428_v19, %v2286_v18 }
 0x107   :  { %v430_v27 = vadd.f32 %v429_v24, %v2293_v22 }
 0x109   :  { %v431_v31 = vrot.slane %v430_v27, 4 }
 0x10b   :  { %v432_v32 = vadd.f32 %v431_v31, %v430_v27 }
 0x10d   :  { %v433_v40 = vrot.slane %v432_v32, 2 }
 0x10f   :  { %v434_v42 = vadd.f32 %v433_v40, %v432_v32 }
 0x111   :  { %v435_v51 = vrot.slane %v434_v42, 1 }
 0x113   :  { %v436_v54 = vadd.f32 %v435_v51, %v434_v42 }
 0x115   :  { %v2321_v55 = vmul.f32 0.00390625, %v436_v54 }
 0x117   :  { %v2325_v57 = vsub.f32 %v2146_v36, %v2321_v55  ;;  %v2329_v59 = vsub.f32 %v2149_v39, %v2321_v55  ;;  %v2333_v61 = vsub.f32 %v2154_v43, %v2321_v55  ;;  %v2341_v2 = vsub.f32 %v2157_v46, %v2321_v55 }
 0x118   :  { %v2345_v36 = vsub.f32 %v2161_v49, %v2321_v55  ;;  %v2351_v43 = vsub.f32 %v2165_v53, %v2321_v55  ;;  %v2357_v46 = vsub.f32 %v2169_v56, %v2321_v55  ;;  %v2363_v12 = vsub.f32 %v2173_v60, %v2321_v55 }
 0x119   :  { %v470_v0 = vmul.f32 %v2325_v57, %v2325_v57  ;;  %v471_v1 = vmul.f32 %v2329_v59, %v2329_v59  ;;  %v472_v39 = vmul.f32 %v2333_v61, %v2333_v61  ;;  %v473_v7 = vmul.f32 %v2341_v2, %v2341_v2 }
 0x11a   :  { %v474_v49 = vmul.f32 %v2345_v36, %v2345_v36  ;;  %v475_v53 = vmul.f32 %v2351_v43, %v2351_v43  ;;  %v2369_v16 = vsub.f32 %v2177_v63, %v2321_v55  ;;  %v476_v56 = vmul.f32 %v2357_v46, %v2357_v46 }
 0x11b   :  { %v502_v5 = vadd.f32 %v471_v1, %v470_v0  ;;  %v2375_v21 = vsub.f32 %v2181_v3, %v2321_v55  ;;  %v477_v60 = vmul.f32 %v2363_v12, %v2363_v12  ;;  %v2381_v26 = vsub.f32 %v2185_v6, %v2321_v55 }
 0x11c   :  { %v478_v63 = vmul.f32 %v2369_v16, %v2369_v16  ;;  %v2387_v29 = vsub.f32 %v2189_v10, %v2321_v55  ;;  %v2393_v34 = vsub.f32 %v2193_v13, %v2321_v55  ;;  %v2399_v35 = vsub.f32 %v2197_v17, %v2321_v55 }
 0x11d   :  { %v503_v9 = vadd.f32 %v502_v5, %v472_v39  ;;  %v479_v3 = vmul.f32 %v2375_v21, %v2375_v21  ;;  %v480_v6 = vmul.f32 %v2381_v26, %v2381_v26  ;;  %v2405_v38 = vsub.f32 %v2201_v20, %v2321_v55 }
 0x11e   :  { %v481_v10 = vmul.f32 %v2387_v29, %v2387_v29  ;;  %v482_v13 = vmul.f32 %v2393_v34, %v2393_v34  ;;  %v2411_v47 = vsub.f32 %v2205_v23, %v2321_v55  ;;  %v483_v17 = vmul.f32 %v2399_v35, %v2399_v35 }
 0x11f   :  { %v504_v11 = vadd.f32 %v503_v9, %v473_v7  ;;  %v2417_v50 = vsub.f32 %v2209_v25, %v2321_v55  ;;  %v484_v20 = vmul.f32 %v2405_v38, %v2405_v38  ;;  %v2423_v54 = vsub.f32 %v2213_v28, %v2321_v55 }
 0x120   :  { %v485_v23 = vmul.f32 %v2411_v47, %v2411_v47  ;;  %v2429_v1 = vsub.f32 %v2217_v30, %v2321_v55  ;;  %v2435_v5 = vsub.f32 %v2221_v33, %v2321_v55  ;;  %v2441_v9 = vsub.f32 %v2225_v37, %v2321_v55 }
 0x121   :  { %v505_v15 = vadd.f32 %v504_v11, %v474_v49  ;;  %v486_v25 = vmul.f32 %v2417_v50, %v2417_v50  ;;  %v487_v28 = vmul.f32 %v2423_v54, %v2423_v54  ;;  %v2447_v11 = vsub.f32 %v2229_v41, %v2321_v55 }
 0x122   :  { %v488_v30 = vmul.f32 %v2429_v1, %v2429_v1  ;;  %v489_v33 = vmul.f32 %v2435_v5, %v2435_v5  ;;  %v490_v37 = vmul.f32 %v2441_v9, %v2441_v9 }
 0x123   :  { %v506_v19 = vadd.f32 %v505_v15, %v475_v53  ;;  %v2453_v15 = vsub.f32 %v2233_v44, %v2321_v55  ;;  %v491_v41 = vmul.f32 %v2447_v11, %v2447_v11 }
 0x125   :  { %v507_v24 = vadd.f32 %v506_v19, %v476_v56  ;;  %v2459_v19 = vsub.f32 %v2237_v48, %v2321_v55  ;;  %v492_v44 = vmul.f32 %v2453_v15, %v2453_v15 }
 0x127   :  { %v508_v27 = vadd.f32 %v507_v24, %v477_v60  ;;  %v2465_v24 = vsub.f32 %v2244_v52, %v2321_v55  ;;  %v493_v48 = vmul.f32 %v2459_v19, %v2459_v19 }
 0x129   :  { %v509_v31 = vadd.f32 %v508_v27, %v478_v63  ;;  %v2471_v27 = vsub.f32 %v2251_v58, %v2321_v55  ;;  %v494_v52 = vmul.f32 %v2465_v24, %v2465_v24 }
 0x12b   :  { %v510_v32 = vadd.f32 %v509_v31, %v479_v3  ;;  %v2477_v31 = vsub.f32 %v2258_v62, %v2321_v55  ;;  %v495_v58 = vmul.f32 %v2471_v27, %v2471_v27 }
 0x12d   :  { %v511_v40 = vadd.f32 %v510_v32, %v480_v6  ;;  %v2483_v32 = vsub.f32 %v2265_v4, %v2321_v55  ;;  %v496_v62 = vmul.f32 %v2477_v31, %v2477_v31 }
 0x12f   :  { %v512_v42 = vadd.f32 %v511_v40, %v481_v10  ;;  %v2489_v40 = vsub.f32 %v2272_v8, %v2321_v55  ;;  %v497_v4 = vmul.f32 %v2483_v32, %v2483_v32 }
 0x131   :  { %v513_v45 = vadd.f32 %v512_v42, %v482_v13  ;;  %v2495_v42 = vsub.f32 %v2279_v14, %v2321_v55  ;;  %v498_v8 = vmul.f32 %v2489_v40, %v2489_v40 }
 0x133   :  { %v514_v51 = vadd.f32 %v513_v45, %v483_v17  ;;  %v2501_v45 = vsub.f32 %v2286_v18, %v2321_v55  ;;  %v499_v14 = vmul.f32 %v2495_v42, %v2495_v42 }
 0x135   :  { %v515_v0 = vadd.f32 %v514_v51, %v484_v20  ;;  %v2507_v51 = vsub.f32 %v2293_v22, %v2321_v55 }
 0x137   :  { %v516_v39 = vadd.f32 %v515_v0, %v485_v23  ;;  %v500_v0 = vmul.f32 %v2501_v45, %v2501_v45  ;;  %v501_v18 = vmul.f32 %v2507_v51, %v2507_v51 }
 0x139   :  { %v517_v7 = vadd.f32 %v516_v39, %v486_v25 }
 0x13b   :  { %v518_v49 = vadd.f32 %v517_v7, %v487_v28 }
 0x13d   :  { %v519_v53 = vadd.f32 %v518_v49, %v488_v30 }
 0x13f   :  { %v520_v56 = vadd.f32 %v519_v53, %v489_v33 }
 0x141   :  { %v521_v60 = vadd.f32 %v520_v56, %v490_v37  ;;  %v545_v56 = vlaneseq }
 0x143   :  { %v522_v63 = vadd.f32 %v521_v60, %v491_v41  ;;  %v2515_v41 = vshrl.u32 %v545_v56, 7  ;;  %v540_v60 = vld [vmem:[%s3278_s3] sm:$0x1] }
 0x145   :  { %v523_v3 = vadd.f32 %v522_v63, %v492_v44 }
 0x147   :  { %v524_v6 = vadd.f32 %v523_v3, %v493_v48  ;;  %v547_v48 = vsub.s32 0, %v2515_v41 }
 0x149   :  { %v525_v10 = vadd.f32 %v524_v6, %v494_v52 }
 0x14b   :  { %v526_v13 = vadd.f32 %v525_v10, %v495_v58  ;;  %v2534_v10 = vld [vmem:[%s3279_s4] ss:$0 sm:$0xff] }
 0x14d   :  { %v527_v17 = vadd.f32 %v526_v13, %v496_v62 }
 0x14f   :  { %v528_v20 = vadd.f32 %v527_v17, %v497_v4 }
 0x151   :  { %v529_v23 = vadd.f32 %v528_v20, %v498_v8 }
 0x153   :  { %v530_v25 = vadd.f32 %v529_v23, %v499_v14 }
 0x155   :  { %v531_v39 = vadd.f32 %v530_v25, %v500_v0 }
 0x157   :  { %v532_v28 = vadd.f32 %v531_v39, %v501_v18 }
 0x159   :  { %v533_v7 = vrot.slane %v532_v28, 4 }
 0x15b   :  { %v534_v30 = vadd.f32 %v533_v7, %v532_v28 }
 0x15d   :  { %v535_v49 = vrot.slane %v534_v30, 2 }
 0x15f   :  { %v536_v33 = vadd.f32 %v535_v49, %v534_v30 }
 0x161   :  { %v537_v53 = vrot.slane %v536_v33, 1 }
 0x163   :  { %v538_v22 = vadd.f32 %v537_v53, %v536_v33 }
 0x165   :  { %v539_v55 = vmul.f32 0.00390625, %v538_v22 }
 0x167   :  { %v541_v37 = vadd.f32 1e-05, %v539_v55 }
 0x169   :  { %1945 = vrsqrt.f32 %v541_v37 }
 0x176   :  { %v1946_v44 = vpop.eup %1945 }
 0x177   :  { %v543_v63 = vmul.f32 %v1946_v44, %v540_v60 }
 0x179   :  { %v2523_v3 = vrot.slane %v543_v63, %v547_v48 }
 0x17b   :  { %v550_v52 = vmul.f32 %v2523_v3, %v2325_v57  ;;  %v551_v6 = vmul.f32 %v2523_v3, %v2329_v59  ;;  %v552_v58 = vmul.f32 %v2523_v3, %v2333_v61  ;;  %v553_v62 = vmul.f32 %v2523_v3, %v2341_v2 }
 0x17c   :  { %v554_v13 = vmul.f32 %v2523_v3, %v2345_v36  ;;  %v555_v61 = vmul.f32 %v2523_v3, %v2351_v43  ;;  %v556_v17 = vmul.f32 %v2523_v3, %v2357_v46  ;;  %v557_v25 = vmul.f32 %v2523_v3, %v2363_v12 }
 0x17d   :  { %v590_v4 = vadd.f32 %v2534_v10, %v551_v6  ;;  %v589_v57 = vadd.f32 %v2534_v10, %v550_v52  ;;  %v591_v59 = vadd.f32 %v2534_v10, %v552_v58  ;;  %v592_v8 = vadd.f32 %v2534_v10, %v553_v62 }
 0x17e   :  { %v593_v20 = vadd.f32 %v2534_v10, %v554_v13  ;;  %v558_v43 = vmul.f32 %v2523_v3, %v2369_v16  ;;  %v594_v18 = vadd.f32 %v2534_v10, %v555_v61  ;;  %v595_v7 = vadd.f32 %v2534_v10, %v556_v17 }
 0x17f   :  { %vm621_vm1 = vcmp.gt.f32.partialorder %v589_v57, 0.0  ;;  %v653_v2 = vmul.f32 0.1, %v589_v57  ;;  %vm622_vm2 = vcmp.gt.f32.partialorder %v590_v4, 0.0  ;;  %v654_v36 = vmul.f32 0.1, %v590_v4 }
 0x180   :  { %vm623_vm3 = vcmp.gt.f32.partialorder %v591_v59, 0.0  ;;  %v655_v14 = vmul.f32 0.1, %v591_v59  ;;  %v656_v46 = vmul.f32 0.1, %v592_v8  ;;  %vm624_vm4 = vcmp.gt.f32.partialorder %v592_v8, 0.0 }
 0x181   :  { %v685_v23 = vsel %vm621_vm1, %v589_v57, %v653_v2  ;;  %v686_v0 = vsel %vm622_vm2, %v590_v4, %v654_v36  ;;  %v657_v28 = vmul.f32 0.1, %v593_v20  ;;  %vm625_vm5 = vcmp.gt.f32.partialorder %v593_v20, 0.0 }
 0x182   :  { %1815 = vmatprep.mubr.f32.mxu1 %v685_v23  ;;  %v687_v39 = vsel %vm623_vm3, %v591_v59, %v655_v14  ;;  %v559_v30 = vmul.f32 %v2523_v3, %v2375_v21  ;;  %v560_v12 = vmul.f32 %v2523_v3, %v2381_v26  ;;  %v688_v49 = vsel %vm624_vm4, %v592_v8, %v656_v46 }
 0x183   :  { %1816 = vmatmul.mubr.f32.vlgmr.msra.gmra.mxu1 %v686_v0  ;;  %v658_v16 = vmul.f32 0.1, %v594_v18  ;;  %v596_v33 = vadd.f32 %v2534_v10, %v557_v25  ;;  %v689_v53 = vsel %vm625_vm5, %v593_v20, %v657_v28  ;;  %vm626_vm6 = vcmp.gt.f32.partialorder %v594_v18, 0.0 }
 0x184   :  { %1818 = vmatprep.mubr.f32.mxu1 %v687_v39  ;;  %v659_v22 = vmul.f32 0.1, %v595_v7  ;;  %v597_v55 = vadd.f32 %v2534_v10, %v558_v43  ;;  %vm627_vm7 = vcmp.gt.f32.partialorder %v595_v7, 0.0  ;;  %v561_v37 = vmul.f32 %v2523_v3, %v2387_v29 }
 0x185   :  { %v562_v21 = vmul.f32 %v2523_v3, %v2393_v34  ;;  %v690_v56 = vsel %vm626_vm6, %v594_v18, %v658_v16  ;;  %v660_v26 = vmul.f32 0.1, %v596_v33  ;;  %v598_v60 = vadd.f32 %v2534_v10, %v559_v30 }
 0x186   :  { %v691_v44 = vsel %vm627_vm7, %v595_v7, %v659_v22  ;;  %vm628_vm8 = vcmp.gt.f32.partialorder %v596_v33, 0.0  ;;  %v661_v63 = vmul.f32 0.1, %v597_v55  ;;  %v599_v52 = vadd.f32 %v2534_v10, %v560_v12 }
 0x187   :  { %1819 = vmatmul.mubr.f32.gmra.mxu1 %v688_v49  ;;  %vm629_vm9 = vcmp.gt.f32.partialorder %v597_v55, 0.0  ;;  %v563_v6 = vmul.f32 %v2523_v3, %v2399_v35  ;;  %v564_v29 = vmul.f32 %v2523_v3, %v2405_v38  ;;  %v692_v58 = vsel %vm628_vm8, %v596_v33, %v660_v26 }
 0x188   :  { %1821 = vmatprep.mubr.f32.mxu1 %v689_v53  ;;  %v662_v34 = vmul.f32 0.1, %v598_v60  ;;  %v600_v62 = vadd.f32 %v2534_v10, %v561_v37  ;;  %v693_v13 = vsel %vm629_vm9, %v597_v55, %v661_v63  ;;  %vm630_vm10 = vcmp.gt.f32.partialorder %v598_v60, 0.0 }
 0x189   :  { %v663_v4 = vmul.f32 0.1, %v599_v52  ;;  %v601_v57 = vadd.f32 %v2534_v10, %v562_v21  ;;  %vm631_vm11 = vcmp.gt.f32.partialorder %v599_v52, 0.0  ;;  %v565_v59 = vmul.f32 %v2523_v3, %v2411_v47 }
 0x18a   :  { %v566_v35 = vmul.f32 %v2523_v3, %v2417_v50  ;;  %v694_v61 = vsel %vm630_vm10, %v598_v60, %v662_v34  ;;  %v664_v38 = vmul.f32 0.1, %v600_v62  ;;  %v602_v17 = vadd.f32 %v2534_v10, %v563_v6 }
 0x18b   :  { %1822 = vmatmul.mubr.f32.gmra.mxu1 %v690_v56  ;;  %v695_v8 = vsel %vm631_vm11, %v599_v52, %v663_v4  ;;  %vm632_vm12 = vcmp.gt.f32.partialorder %v600_v62, 0.0  ;;  %v665_v20 = vmul.f32 0.1, %v601_v57  ;;  %v603_v2 = vadd.f32 %v2534_v10, %v564_v29 }
 0x18c   :  { %1824 = vmatprep.mubr.f32.mxu1 %v691_v44  ;;  %vm633_vm13 = vcmp.gt.f32.partialorder %v601_v57, 0.0  ;;  %v567_v36 = vmul.f32 %v2523_v3, %v2423_v54  ;;  %v568_v47 = vmul.f32 %v2523_v3, %v2429_v1  ;;  %v696_v14 = vsel %vm632_vm12, %v600_v62, %v664_v38 }
 0x18d   :  { %v666_v50 = vmul.f32 0.1, %v602_v17  ;;  %v604_v23 = vadd.f32 %v2534_v10, %v565_v59  ;;  %v697_v0 = vsel %vm633_vm13, %v601_v57, %v665_v20  ;;  %vm634_vm14 = vcmp.gt.f32.partialorder %v602_v17, 0.0 }
 0x18e   :  { %v667_v25 = vmul.f32 0.1, %v603_v2  ;;  %v605_v43 = vadd.f32 %v2534_v10, %v566_v35  ;;  %vm635_vm15 = vcmp.gt.f32.partialorder %v603_v2, 0.0  ;;  %v569_v46 = vmul.f32 %v2523_v3, %v2435_v5 }
 0x18f   :  { %1825 = vmatmul.mubr.f32.gmra.mxu1 %v692_v58  ;;  %v570_v54 = vmul.f32 %v2523_v3, %v2441_v9  ;;  %v698_v18 = vsel %vm634_vm14, %v602_v17, %v666_v50  ;;  %v668_v1 = vmul.f32 0.1, %v604_v23  ;;  %v606_v39 = vadd.f32 %v2534_v10, %v567_v36 }
 0x190   :  { %1827 = vmatprep.mubr.f32.mxu1 %v693_v13  ;;  %v699_v28 = vsel %vm635_vm15, %v603_v2, %v667_v25  ;;  %vm636_vm0 = vcmp.gt.f32.partialorder %v604_v23, 0.0  ;;  %v669_v7 = vmul.f32 0.1, %v605_v43  ;;  %v607_v30 = vadd.f32 %v2534_v10, %v568_v47 }
 0x191   :  { %vm637_vm1 = vcmp.gt.f32.partialorder %v605_v43, 0.0  ;;  %v571_v12 = vmul.f32 %v2523_v3, %v2447_v11  ;;  %v572_v5 = vmul.f32 %v2523_v3, %v2453_v15  ;;  %v700_v49 = vsel %vm636_vm0, %v604_v23, %v668_v1 }
 0x192   :  { %v670_v9 = vmul.f32 0.1, %v606_v39  ;;  %v608_v16 = vadd.f32 %v2534_v10, %v569_v46  ;;  %v701_v33 = vsel %vm637_vm1, %v605_v43, %v669_v7  ;;  %vm638_vm2 = vcmp.gt.f32.partialorder %v606_v39, 0.0 }
 0x193   :  { %1828 = vmatmul.mubr.f32.gmra.mxu1 %v694_v61  ;;  %v671_v53 = vmul.f32 0.1, %v607_v30  ;;  %v609_v22 = vadd.f32 %v2534_v10, %v570_v54  ;;  %vm639_vm3 = vcmp.gt.f32.partialorder %v607_v30, 0.0  ;;  %v573_v55 = vmul.f32 %v2523_v3, %v2459_v19 }
 0x194   :  { %1830 = vmatprep.mubr.f32.mxu1 %v695_v8  ;;  %v574_v11 = vmul.f32 %v2523_v3, %v2465_v24  ;;  %v702_v37 = vsel %vm638_vm2, %v606_v39, %v670_v9  ;;  %v672_v15 = vmul.f32 0.1, %v608_v16  ;;  %v610_v21 = vadd.f32 %v2534_v10, %v571_v12  ;;  %v2629_v39 = vld [vmem:[%s3280_s6] ss:$0 sm:$0xff] }
 0x195   :  { %v703_v56 = vsel %vm639_vm3, %v607_v30, %v671_v53  ;;  %vm640_vm4 = vcmp.gt.f32.partialorder %v608_v16, 0.0  ;;  %v673_v26 = vmul.f32 0.1, %v609_v22  ;;  %v611_v60 = vadd.f32 %v2534_v10, %v572_v5 }
 0x196   :  { %vm641_vm5 = vcmp.gt.f32.partialorder %v609_v22, 0.0  ;;  %v575_v44 = vmul.f32 %v2523_v3, %v2471_v27  ;;  %v576_v19 = vmul.f32 %v2523_v3, %v2477_v31  ;;  %v704_v63 = vsel %vm640_vm4, %v608_v16, %v672_v15 }
 0x197   :  { %1831 = vmatmul.mubr.f32.gmra.mxu1 %v696_v14  ;;  %v674_v24 = vmul.f32 0.1, %v610_v21  ;;  %v612_v52 = vadd.f32 %v2534_v10, %v573_v55  ;;  %v705_v6 = vsel %vm641_vm5, %v609_v22, %v673_v26  ;;  %vm642_vm6 = vcmp.gt.f32.partialorder %v610_v21, 0.0 }
 0x198   :  { %1833 = vmatprep.mubr.f32.mxu1 %v697_v0  ;;  %v675_v29 = vmul.f32 0.1, %v611_v60  ;;  %v613_v58 = vadd.f32 %v2534_v10, %v574_v11  ;;  %vm643_vm7 = vcmp.gt.f32.partialorder %v611_v60, 0.0  ;;  %v577_v34 = vmul.f32 %v2523_v3, %v2483_v32 }
 0x199   :  { %v578_v27 = vmul.f32 %v2523_v3, %v2489_v40  ;;  %v706_v62 = vsel %vm642_vm6, %v610_v21, %v674_v24  ;;  %v676_v31 = vmul.f32 0.1, %v612_v52  ;;  %v614_v13 = vadd.f32 %v2534_v10, %v575_v44 }
 0x19a   :  { %v707_v4 = vsel %vm643_vm7, %v611_v60, %v675_v29  ;;  %vm644_vm8 = vcmp.gt.f32.partialorder %v612_v52, 0.0  ;;  %v677_v57 = vmul.f32 0.1, %v613_v58  ;;  %v615_v59 = vadd.f32 %v2534_v10, %v576_v19 }
 0x19b   :  { %1834 = vmatmul.mubr.f32.gmra.mxu1 %v698_v18  ;;  %vm645_vm9 = vcmp.gt.f32.partialorder %v613_v58, 0.0  ;;  %v580_v35 = vmul.f32 %v2523_v3, %v2501_v45  ;;  %v579_v32 = vmul.f32 %v2523_v3, %v2495_v42  ;;  %v708_v61 = vsel %vm644_vm8, %v612_v52, %v676_v31 }
 0x19c   :  { %1836 = vmatprep.mubr.f32.mxu1 %v699_v28  ;;  %v678_v40 = vmul.f32 0.1, %v614_v13  ;;  %v616_v38 = vadd.f32 %v2534_v10, %v577_v34  ;;  %v709_v17 = vsel %vm645_vm9, %v613_v58, %v677_v57  ;;  %vm646_vm10 = vcmp.gt.f32.partialorder %v614_v13, 0.0 }
 0x19d   :  { %v679_v8 = vmul.f32 0.1, %v615_v59  ;;  %v617_v20 = vadd.f32 %v2534_v10, %v578_v27  ;;  %vm647_vm11 = vcmp.gt.f32.partialorder %v615_v59, 0.0  ;;  %v581_v2 = vmul.f32 %v2523_v3, %v2507_v51 }
 0x19e   :  { %v710_v36 = vsel %vm646_vm10, %v614_v13, %v678_v40  ;;  %v680_v45 = vmul.f32 0.1, %v616_v38  ;;  %v618_v47 = vadd.f32 %v2534_v10, %v579_v32  ;;  %vm648_vm12 = vcmp.gt.f32.partialorder %v616_v38, 0.0 }
 0x19f   :  { %1837 = vmatmul.mubr.f32.gmra.mxu1 %v700_v49  ;;  %v711_v42 = vsel %vm647_vm11, %v615_v59, %v679_v8  ;;  %v681_v14 = vmul.f32 0.1, %v617_v20  ;;  %v619_v50 = vadd.f32 %v2534_v10, %v580_v35  ;;  %vm649_vm13 = vcmp.gt.f32.partialorder %v617_v20, 0.0 }
 0x1a0   :  { %1839 = vmatprep.mubr.f32.mxu1 %v701_v33  ;;  %v712_v23 = vsel %vm648_vm12, %v616_v38, %v680_v45  ;;  %v682_v0 = vmul.f32 0.1, %v618_v47  ;;  %v620_v25 = vadd.f32 %v2534_v10, %v581_v2  ;;  %vm650_vm14 = vcmp.gt.f32.partialorder %v618_v47, 0.0 }
 0x1a1   :  { %v713_v43 = vsel %vm649_vm13, %v617_v20, %v681_v14  ;;  %v683_v51 = vmul.f32 0.1, %v619_v50  ;;  %vm651_vm15 = vcmp.gt.f32.partialorder %v619_v50, 0.0 }
 0x1a2   :  { %v714_v3 = vsel %vm650_vm14, %v618_v47, %v682_v0  ;;  %v684_v46 = vmul.f32 0.1, %v620_v25  ;;  %vm652_vm0 = vcmp.gt.f32.partialorder %v620_v25, 0.0 }
 0x1a3   :  { %1840 = vmatmul.mubr.f32.gmra.mxu1 %v702_v37  ;;  %v715_v54 = vsel %vm651_vm15, %v619_v50, %v683_v51 }
 0x1a4   :  { %1842 = vmatprep.mubr.f32.mxu1 %v703_v56  ;;  %v716_v18 = vsel %vm652_vm0, %v620_v25, %v684_v46 }
 0x1a7   :  { %1843 = vmatmul.mubr.f32.gmra.mxu1 %v704_v63 }
 0x1a8   :  { %1845 = vmatprep.mubr.f32.mxu1 %v705_v6 }
 0x1ab   :  { %1846 = vmatmul.mubr.f32.gmra.mxu1 %v706_v62 }
 0x1ac   :  { %1848 = vmatprep.mubr.f32.mxu1 %v707_v4 }
 0x1af   :  { %1849 = vmatmul.mubr.f32.gmra.mxu1 %v708_v61 }
 0x1b0   :  { %1851 = vmatprep.mubr.f32.mxu1 %v709_v17 }
 0x1b3   :  { %1852 = vmatmul.mubr.f32.gmra.mxu1 %v710_v36 }
 0x1b4   :  { %1854 = vmatprep.mubr.f32.mxu1 %v711_v42 }
 0x1b7   :  { %1855 = vmatmul.mubr.f32.gmra.mxu1 %v712_v23 }
 0x1b8   :  { %1857 = vmatprep.mubr.f32.mxu1 %v713_v43 }
 0x1bb   :  { %1858 = vmatmul.mubr.f32.gmra.mxu1 %v714_v3 }
 0x1bc   :  { %1860 = vmatprep.mubr.f32.mxu1 %v715_v54 }
 0x1bf   :  { %1861 = vmatmul.mubr.f32.gmra.mxu1 %v716_v18 }
 0x243   :  { %v1817_v1 = vpop.f32.mrf.mxu1 }
 0x244   :  { %v2635_v30 = vadd.f32 %v1817_v1, %v2629_v39 }
 0x245   :  { %v806_v10 = vpop.f32.mrf.mxu1 }
 0x246   :  { %v2632_v28 = vadd.f32 %v2629_v39, %v806_v10 }
 0x247   :  { %v1820_v7 = vpop.f32.mrf.mxu1 }
 0x248   :  { %v965_v5 = vadd.f32 %v2635_v30, %v2632_v28  ;;  %v2643_v16 = vadd.f32 %v1820_v7, %v2629_v39 }
 0x249   :  { %v816_v12 = vpop.f32.mrf.mxu1 }
 0x24a   :  { %v2640_v49 = vadd.f32 %v2629_v39, %v816_v12 }
 0x24b   :  { %v1823_v9 = vpop.f32.mrf.mxu1 }
 0x24c   :  { %v966_v33 = vadd.f32 %v965_v5, %v2640_v49  ;;  %v2651_v37 = vadd.f32 %v1823_v9, %v2629_v39 }
 0x24d   :  { %v826_v53 = vpop.f32.mrf.mxu1 }
 0x24e   :  { %v2647_v22 = vadd.f32 %v2629_v39, %v826_v53  ;;  %v967_v55 = vadd.f32 %v966_v33, %v2643_v16 }
 0x24f   :  { %v1826_v11 = vpop.f32.mrf.mxu1 }
 0x250   :  { %v968_v15 = vadd.f32 %v967_v55, %v2647_v22  ;;  %v2659_v44 = vadd.f32 %v1826_v11, %v2629_v39 }
 0x251   :  { %v836_v21 = vpop.f32.mrf.mxu1 }
 0x252   :  { %v2655_v56 = vadd.f32 %v2629_v39, %v836_v21  ;;  %v969_v26 = vadd.f32 %v968_v15, %v2651_v37 }
 0x253   :  { %v1829_v60 = vpop.f32.mrf.mxu1 }
 0x254   :  { %v970_v19 = vadd.f32 %v969_v26, %v2655_v56  ;;  %v2667_v29 = vadd.f32 %v1829_v60, %v2629_v39 }
 0x255   :  { %v846_v63 = vpop.f32.mrf.mxu1 }
 0x256   :  { %v2663_v24 = vadd.f32 %v2629_v39, %v846_v63  ;;  %v971_v52 = vadd.f32 %v970_v19, %v2659_v44 }
 0x257   :  { %v1832_v6 = vpop.f32.mrf.mxu1 }
 0x258   :  { %v972_v58 = vadd.f32 %v971_v52, %v2663_v24  ;;  %v2675_v13 = vadd.f32 %v1832_v6, %v2629_v39 }
 0x259   :  { %v856_v34 = vpop.f32.mrf.mxu1 }
 0x25a   :  { %v2671_v27 = vadd.f32 %v2629_v39, %v856_v34  ;;  %v973_v62 = vadd.f32 %v972_v58, %v2667_v29 }
 0x25b   :  { %v1835_v31 = vpop.f32.mrf.mxu1 }
 0x25c   :  { %v974_v4 = vadd.f32 %v973_v62, %v2671_v27  ;;  %v2683_v61 = vadd.f32 %v1835_v31, %v2629_v39 }
 0x25d   :  { %v866_v57 = vpop.f32.mrf.mxu1 }
 0x25e   :  { %v2679_v59 = vadd.f32 %v2629_v39, %v866_v57  ;;  %v975_v35 = vadd.f32 %v974_v4, %v2675_v13 }
 0x25f   :  { %v1838_v32 = vpop.f32.mrf.mxu1 }
 0x260   :  { %v976_v40 = vadd.f32 %v975_v35, %v2679_v59  ;;  %v2691_v2 = vadd.f32 %v1838_v32, %v2629_v39  ;;  %v1297_v32 = vld [vmem:[%s3281_s9 + $0x78] sm:$0xff] }
 0x261   :  { %v876_v38 = vpop.f32.mrf.mxu1  ;;  %1863 = vmatprep.subr.mxu0 %v1297_v32 }
 0x262   :  { %v2687_v17 = vadd.f32 %v2629_v39, %v876_v38  ;;  %v977_v8 = vadd.f32 %v976_v40, %v2683_v61  ;;  %1864 = vmatpush3.msra.mxu0 %v1297_v32 }
 0x263   :  { %v1841_v20 = vpop.f32.mrf.mxu1 }
 0x264   :  { %v978_v36 = vadd.f32 %v977_v8, %v2687_v17  ;;  %v2699_v50 = vadd.f32 %v1841_v20, %v2629_v39  ;;  %v1296_v20 = vld [vmem:[%s3281_s9 + $0x70] sm:$0xff] }
 0x265   :  { %v886_v45 = vpop.f32.mrf.mxu1  ;;  %1865 = vmatprep.subr.mxu0 %v1296_v20 }
 0x266   :  { %v2695_v47 = vadd.f32 %v2629_v39, %v886_v45  ;;  %v979_v42 = vadd.f32 %v978_v36, %v2691_v2  ;;  %1866 = vmatpush3.msra.mxu0 %v1296_v20 }
 0x267   :  { %v1844_v14 = vpop.f32.mrf.mxu1 }
 0x268   :  { %v980_v23 = vadd.f32 %v979_v42, %v2695_v47  ;;  %v2707_v3 = vadd.f32 %v1844_v14, %v2629_v39  ;;  %v1295_v14 = vld [vmem:[%s3281_s9 + $0x68] sm:$0xff] }
 0x269   :  { %v896_v0 = vpop.f32.mrf.mxu1  ;;  %1867 = vmatprep.subr.mxu0 %v1295_v14 }
 0x26a   :  { %v2703_v25 = vadd.f32 %v2629_v39, %v896_v0  ;;  %v981_v43 = vadd.f32 %v980_v23, %v2699_v50  ;;  %1868 = vmatpush3.msra.mxu0 %v1295_v14 }
 0x26b   :  { %v1847_v51 = vpop.f32.mrf.mxu1 }
 0x26c   :  { %v982_v46 = vadd.f32 %v981_v43, %v2703_v25  ;;  %v2715_v7 = vadd.f32 %v1847_v51, %v2629_v39  ;;  %v1294_v43 = vld [vmem:[%s3281_s9 + $0x60] sm:$0xff] }
 0x26d   :  { %v906_v54 = vpop.f32.mrf.mxu1  ;;  %1869 = vmatprep.subr.mxu0 %v1294_v43 }
 0x26e   :  { %v2711_v18 = vadd.f32 %v2629_v39, %v906_v54  ;;  %v983_v1 = vadd.f32 %v982_v46, %v2707_v3  ;;  %1870 = vmatpush3.msra.mxu0 %v1294_v43  ;;  %v1293_v46 = vld [vmem:[%s3281_s9 + $0x58] sm:$0xff] }
 0x26f   :  { %v1850_v10 = vpop.f32.mrf.mxu1  ;;  %1871 = vmatprep.subr.mxu0 %v1293_v46 }
 0x270   :  { %v984_v12 = vadd.f32 %v983_v1, %v2711_v18  ;;  %v2723_v55 = vadd.f32 %v1850_v10, %v2629_v39  ;;  %1872 = vmatpush3.msra.mxu0 %v1293_v46  ;;  %v1291_v10 = vld [vmem:[%s3281_s9 + $0x48] sm:$0xff] }
 0x271   :  { %v916_v5 = vpop.f32.mrf.mxu1 }
 0x272   :  { %v2719_v9 = vadd.f32 %v2629_v39, %v916_v5  ;;  %v985_v33 = vadd.f32 %v984_v12, %v2715_v7  ;;  %v1290_v5 = vld [vmem:[%s3281_s9 + $0x40] sm:$0xff] }
 0x273   :  { %v1853_v53 = vpop.f32.mrf.mxu1 }
 0x274   :  { %v986_v11 = vadd.f32 %v985_v33, %v2719_v9  ;;  %v2731_v19 = vadd.f32 %v1853_v53, %v2629_v39  ;;  %v1289_v53 = vld [vmem:[%s3281_s9 + $0x38] sm:$0xff] }
 0x275   :  { %v926_v15 = vpop.f32.mrf.mxu1 }
 0x276   :  { %v2727_v21 = vadd.f32 %v2629_v39, %v926_v15  ;;  %v987_v26 = vadd.f32 %v986_v11, %v2723_v55  ;;  %v1288_v11 = vld [vmem:[%s3281_s9 + $0x30] sm:$0xff]  ;;  %v1287_v15 = vld [vmem:[%s3281_s9 + $0x28] sm:$0xff] }
 0x277   :  { %v1856_v60 = vpop.f32.mrf.mxu1 }
 0x278   :  { %v988_v63 = vadd.f32 %v987_v26, %v2727_v21  ;;  %v2739_v62 = vadd.f32 %v1856_v60, %v2629_v39  ;;  %v1286_v60 = vld [vmem:[%s3281_s9 + $0x20] sm:$0xff] }
 0x279   :  { %v936_v52 = vpop.f32.mrf.mxu1 }
 0x27a   :  { %v2735_v6 = vadd.f32 %v2629_v39, %v936_v52  ;;  %v989_v58 = vadd.f32 %v988_v63, %v2731_v19  ;;  %v1285_v63 = vld [vmem:[%s3281_s9 + $0x18] sm:$0xff] }
 0x27b   :  { %v1859_v34 = vpop.f32.mrf.mxu1 }
 0x27c   :  { %v990_v31 = vadd.f32 %v989_v58, %v2735_v6  ;;  %v2750_v38 = vadd.f32 %v1859_v34, %v2629_v39  ;;  %v1284_v58 = vld [vmem:[%s3281_s9 + $0x10] sm:$0xff]  ;;  %v1283_v34 = vld [vmem:[%s3281_s9 + $0x8] sm:$0xff] }
 0x27d   :  { %v946_v4 = vpop.f32.mrf.mxu1 }
 0x27e   :  { %v2743_v57 = vadd.f32 %v2629_v39, %v946_v4  ;;  %v991_v35 = vadd.f32 %v990_v31, %v2739_v62  ;;  %v1282_v4 = vld [vmem:[%s3281_s9] sm:$0xff] }
 0x27f   :  { %v1862_v40 = vpop.f32.mrf.mxu1 }
 0x280   :  { %v992_v8 = vadd.f32 %v991_v35, %v2743_v57  ;;  %v2764_v23 = vadd.f32 %v1862_v40, %v2629_v39 }
 0x281   :  { %v956_v36 = vpop.f32.mrf.mxu1 }
 0x282   :  { %v2757_v45 = vadd.f32 %v2629_v39, %v956_v36  ;;  %v993_v42 = vadd.f32 %v992_v8, %v2750_v38  ;;  %v1292_v39 = vld [vmem:[%s3281_s9 + $0x50] sm:$0xff] }
 0x283   :  { %1873 = vmatprep.subr.mxu0 %v1292_v39 }
 0x284   :  { %v994_v0 = vadd.f32 %v993_v42, %v2757_v45  ;;  %1874 = vmatpush3.msra.mxu0 %v1292_v39 }
 0x285   :  { %1875 = vmatprep.subr.mxu0 %v1291_v10 }
 0x286   :  { %v995_v51 = vadd.f32 %v994_v0, %v2764_v23  ;;  %1876 = vmatpush3.msra.mxu0 %v1291_v10 }
 0x287   :  { %1877 = vmatprep.subr.mxu0 %v1290_v5 }
 0x288   :  { %v996_v54 = vrot.slane %v995_v51, 4  ;;  %1878 = vmatpush3.msra.mxu0 %v1290_v5 }
 0x289   :  { %1879 = vmatprep.subr.mxu0 %v1289_v53 }
 0x28a   :  { %v997_v1 = vadd.f32 %v996_v54, %v995_v51  ;;  %1880 = vmatpush3.msra.mxu0 %v1289_v53 }
 0x28b   :  { %1881 = vmatprep.subr.mxu0 %v1288_v11 }
 0x28c   :  { %v998_v12 = vrot.slane %v997_v1, 2  ;;  %1882 = vmatpush3.msra.mxu0 %v1288_v11 }
 0x28d   :  { %1883 = vmatprep.subr.mxu0 %v1287_v15 }
 0x28e   :  { %v999_v33 = vadd.f32 %v998_v12, %v997_v1  ;;  %1884 = vmatpush3.msra.mxu0 %v1287_v15 }
 0x28f   :  { %1885 = vmatprep.subr.mxu0 %v1286_v60 }
 0x290   :  { %v1000_v26 = vrot.slane %v999_v33, 1  ;;  %1886 = vmatpush3.msra.mxu0 %v1286_v60 }
 0x291   :  { %1887 = vmatprep.subr.mxu0 %v1285_v63 }
 0x292   :  { %v1001_v52 = vadd.f32 %v1000_v26, %v999_v33  ;;  %1888 = vmatpush3.msra.mxu0 %v1285_v63 }
 0x293   :  { %1889 = vmatprep.subr.mxu0 %v1284_v58 }
 0x294   :  { %v2804_v31 = vmul.f32 0.00390625, %v1001_v52  ;;  %1890 = vmatpush3.msra.mxu0 %v1284_v58 }
 0x295   :  { %1891 = vmatprep.subr.mxu0 %v1283_v34 }
 0x296   :  { %1892 = vmatpush3.msra.mxu0 %v1283_v34  ;;  %v2811_v35 = vsub.f32 %v2632_v28, %v2804_v31  ;;  %v2815_v32 = vsub.f32 %v2635_v30, %v2804_v31  ;;  %v2819_v40 = vsub.f32 %v2640_v49, %v2804_v31  ;;  %v2827_v36 = vsub.f32 %v2643_v16, %v2804_v31 }
 0x297   :  { %1893 = vmatprep.subr.mxu0 %v1282_v4  ;;  %v2831_v28 = vsub.f32 %v2647_v22, %v2804_v31  ;;  %v2837_v49 = vsub.f32 %v2651_v37, %v2804_v31  ;;  %v2843_v16 = vsub.f32 %v2655_v56, %v2804_v31  ;;  %v2849_v51 = vsub.f32 %v2659_v44, %v2804_v31 }
 0x298   :  { %1894 = vmatpush3.msra.mxu0 %v1282_v4  ;;  %v1035_v8 = vmul.f32 %v2811_v35, %v2811_v35  ;;  %v1036_v20 = vmul.f32 %v2815_v32, %v2815_v32  ;;  %v1037_v30 = vmul.f32 %v2819_v40, %v2819_v40  ;;  %v1038_v14 = vmul.f32 %v2827_v36, %v2827_v36 }
 0x299   :  { %v1039_v22 = vmul.f32 %v2831_v28, %v2831_v28  ;;  %v1040_v37 = vmul.f32 %v2837_v49, %v2837_v49  ;;  %v2855_v54 = vsub.f32 %v2663_v24, %v2804_v31  ;;  %v1041_v56 = vmul.f32 %v2843_v16, %v2843_v16 }
 0x29a   :  { %v1067_v42 = vadd.f32 %v1036_v20, %v1035_v8  ;;  %v2861_v1 = vsub.f32 %v2667_v29, %v2804_v31  ;;  %v1042_v44 = vmul.f32 %v2849_v51, %v2849_v51  ;;  %v2867_v12 = vsub.f32 %v2671_v27, %v2804_v31 }
 0x29b   :  { %v1043_v24 = vmul.f32 %v2855_v54, %v2855_v54  ;;  %v2873_v33 = vsub.f32 %v2675_v13, %v2804_v31  ;;  %v2879_v11 = vsub.f32 %v2679_v59, %v2804_v31  ;;  %v2885_v26 = vsub.f32 %v2683_v61, %v2804_v31 }
 0x29c   :  { %v1068_v0 = vadd.f32 %v1067_v42, %v1037_v30  ;;  %v1044_v29 = vmul.f32 %v2861_v1, %v2861_v1  ;;  %v1045_v27 = vmul.f32 %v2867_v12, %v2867_v12  ;;  %v2891_v63 = vsub.f32 %v2687_v17, %v2804_v31 }
 0x29d   :  { %v1046_v13 = vmul.f32 %v2873_v33, %v2873_v33  ;;  %v1047_v59 = vmul.f32 %v2879_v11, %v2879_v11  ;;  %v2897_v58 = vsub.f32 %v2691_v2, %v2804_v31  ;;  %v1048_v61 = vmul.f32 %v2885_v26, %v2885_v26 }
 0x29e   :  { %v1069_v43 = vadd.f32 %v1068_v0, %v1038_v14  ;;  %v2903_v4 = vsub.f32 %v2695_v47, %v2804_v31  ;;  %v1049_v17 = vmul.f32 %v2891_v63, %v2891_v63  ;;  %v2909_v20 = vsub.f32 %v2699_v50, %v2804_v31 }
 0x29f   :  { %v1050_v2 = vmul.f32 %v2897_v58, %v2897_v58  ;;  %v2915_v42 = vsub.f32 %v2703_v25, %v2804_v31  ;;  %v2921_v0 = vsub.f32 %v2707_v3, %v2804_v31 }
 0x2a0   :  { %v1070_v46 = vadd.f32 %v1069_v43, %v1039_v22  ;;  %v1051_v47 = vmul.f32 %v2903_v4, %v2903_v4  ;;  %v1052_v50 = vmul.f32 %v2909_v20, %v2909_v20  ;;  %v2927_v43 = vsub.f32 %v2711_v18, %v2804_v31 }
 0x2a1   :  { %v1053_v25 = vmul.f32 %v2915_v42, %v2915_v42  ;;  %v1054_v3 = vmul.f32 %v2921_v0, %v2921_v0 }
 0x2a2   :  { %v1071_v39 = vadd.f32 %v1070_v46, %v1040_v37  ;;  %v2933_v46 = vsub.f32 %v2715_v7, %v2804_v31  ;;  %v1055_v18 = vmul.f32 %v2927_v43, %v2927_v43 }
 0x2a4   :  { %v1072_v10 = vadd.f32 %v1071_v39, %v1041_v56  ;;  %v2939_v39 = vsub.f32 %v2719_v9, %v2804_v31  ;;  %v1056_v7 = vmul.f32 %v2933_v46, %v2933_v46 }
 0x2a6   :  { %v1073_v5 = vadd.f32 %v1072_v10, %v1042_v44  ;;  %v2945_v10 = vsub.f32 %v2723_v55, %v2804_v31  ;;  %v1057_v9 = vmul.f32 %v2939_v39, %v2939_v39 }
 0x2a8   :  { %v1074_v53 = vadd.f32 %v1073_v5, %v1043_v24  ;;  %v2951_v5 = vsub.f32 %v2727_v21, %v2804_v31  ;;  %v1058_v55 = vmul.f32 %v2945_v10, %v2945_v10 }
 0x2aa   :  { %v1075_v15 = vadd.f32 %v1074_v53, %v1044_v29  ;;  %v2957_v53 = vsub.f32 %v2731_v19, %v2804_v31  ;;  %v1059_v21 = vmul.f32 %v2951_v5, %v2951_v5 }
 0x2ac   :  { %v1076_v60 = vadd.f32 %v1075_v15, %v1045_v27  ;;  %v2963_v15 = vsub.f32 %v2735_v6, %v2804_v31  ;;  %v1060_v19 = vmul.f32 %v2957_v53, %v2957_v53 }
 0x2ae   :  { %v1077_v52 = vadd.f32 %v1076_v60, %v1046_v13  ;;  %v2969_v60 = vsub.f32 %v2739_v62, %v2804_v31  ;;  %v1061_v6 = vmul.f32 %v2963_v15, %v2963_v15 }
 0x2b0   :  { %v1078_v34 = vadd.f32 %v1077_v52, %v1047_v59  ;;  %v2975_v52 = vsub.f32 %v2743_v57, %v2804_v31  ;;  %v1062_v62 = vmul.f32 %v2969_v60, %v2969_v60 }
 0x2b2   :  { %v1079_v8 = vadd.f32 %v1078_v34, %v1048_v61  ;;  %v2981_v34 = vsub.f32 %v2750_v38, %v2804_v31  ;;  %v1063_v57 = vmul.f32 %v2975_v52, %v2975_v52 }
 0x2b4   :  { %v1080_v30 = vadd.f32 %v1079_v8, %v1049_v17  ;;  %v2987_v8 = vsub.f32 %v2757_v45, %v2804_v31  ;;  %v1064_v38 = vmul.f32 %v2981_v34, %v2981_v34 }
 0x2b6   :  { %v1081_v14 = vadd.f32 %v1080_v30, %v1050_v2  ;;  %v2993_v30 = vsub.f32 %v2764_v23, %v2804_v31 }
 0x2b8   :  { %v1082_v22 = vadd.f32 %v1081_v14, %v1051_v47  ;;  %v1065_v14 = vmul.f32 %v2987_v8, %v2987_v8  ;;  %v1066_v45 = vmul.f32 %v2993_v30, %v2993_v30 }
 0x2ba   :  { %v1083_v37 = vadd.f32 %v1082_v22, %v1052_v50 }
 0x2bc   :  { %v1084_v56 = vadd.f32 %v1083_v37, %v1053_v25 }
 0x2be   :  { %v1085_v44 = vadd.f32 %v1084_v56, %v1054_v3 }
 0x2c0   :  { %v1086_v24 = vadd.f32 %v1085_v44, %v1055_v18 }
 0x2c2   :  { %v1087_v29 = vadd.f32 %v1086_v24, %v1056_v7  ;;  %v1105_v24 = vld [vmem:[%s3282_s7] sm:$0x1] }
 0x2c4   :  { %v1088_v27 = vadd.f32 %v1087_v29, %v1057_v9 }
 0x2c6   :  { %v1089_v13 = vadd.f32 %v1088_v27, %v1058_v55 }
 0x2c8   :  { %v1090_v59 = vadd.f32 %v1089_v13, %v1059_v21 }
 0x2ca   :  { %v1091_v61 = vadd.f32 %v1090_v59, %v1060_v19  ;;  %v3017_v19 = vld [vmem:[%s3283_s8] ss:$0 sm:$0xff] }
 0x2cc   :  { %v1092_v17 = vadd.f32 %v1091_v61, %v1061_v6 }
 0x2ce   :  { %v1093_v2 = vadd.f32 %v1092_v17, %v1062_v62 }
 0x2d0   :  { %v1094_v47 = vadd.f32 %v1093_v2, %v1063_v57 }
 0x2d2   :  { %v1095_v50 = vadd.f32 %v1094_v47, %v1064_v38 }
 0x2d4   :  { %v1096_v22 = vadd.f32 %v1095_v50, %v1065_v14 }
 0x2d6   :  { %v1097_v25 = vadd.f32 %v1096_v22, %v1066_v45 }
 0x2d8   :  { %v1098_v37 = vrot.slane %v1097_v25, 4 }
 0x2da   :  { %v1099_v3 = vadd.f32 %v1098_v37, %v1097_v25 }
 0x2dc   :  { %v1100_v56 = vrot.slane %v1099_v3, 2 }
 0x2de   :  { %v1101_v18 = vadd.f32 %v1100_v56, %v1099_v3 }
 0x2e0   :  { %v1102_v44 = vrot.slane %v1101_v18, 1 }
 0x2e2   :  { %v1103_v23 = vadd.f32 %v1102_v44, %v1101_v18 }
 0x2e4   :  { %v1104_v31 = vmul.f32 0.00390625, %v1103_v23 }
 0x2e6   :  { %v1106_v7 = vadd.f32 1e-05, %v1104_v31 }
 0x2e8   :  { %1947 = vrsqrt.f32 %v1106_v7 }
 0x2f5   :  { %v1948_v9 = vpop.eup %1947 }
 0x2f6   :  { %v1108_v29 = vmul.f32 %v1948_v9, %v1105_v24 }
 0x2f8   :  { %v3006_v55 = vrot.slane %v1108_v29, %v547_v48 }
 0x2fa   :  { %v1115_v27 = vmul.f32 %v3006_v55, %v2811_v35  ;;  %v1116_v21 = vmul.f32 %v3006_v55, %v2815_v32  ;;  %v1117_v13 = vmul.f32 %v3006_v55, %v2819_v40  ;;  %v1118_v59 = vmul.f32 %v3006_v55, %v2827_v36 }
 0x2fb   :  { %v1119_v41 = vmul.f32 %v3006_v55, %v2831_v28  ;;  %v1120_v40 = vmul.f32 %v3006_v55, %v2837_v49  ;;  %v1121_v6 = vmul.f32 %v3006_v55, %v2843_v16  ;;  %v1122_v38 = vmul.f32 %v3006_v55, %v2849_v51 }
 0x2fc   :  { %v1155_v48 = vadd.f32 %v3017_v19, %v1116_v21  ;;  %v1154_v35 = vadd.f32 %v3017_v19, %v1115_v27  ;;  %v1156_v32 = vadd.f32 %v3017_v19, %v1117_v13  ;;  %v1157_v61 = vadd.f32 %v3017_v19, %v1118_v59 }
 0x2fd   :  { %v1158_v62 = vadd.f32 %v3017_v19, %v1119_v41  ;;  %v1123_v49 = vmul.f32 %v3006_v55, %v2855_v54  ;;  %v1159_v47 = vadd.f32 %v3017_v19, %v1120_v40  ;;  %v1160_v45 = vadd.f32 %v3017_v19, %v1121_v6 }
 0x2fe   :  { %vm1186_vm1 = vcmp.gt.f32.partialorder %v1154_v35, 0.0  ;;  %v1218_v36 = vmul.f32 0.1, %v1154_v35  ;;  %vm1187_vm2 = vcmp.gt.f32.partialorder %v1155_v48, 0.0  ;;  %v1219_v28 = vmul.f32 0.1, %v1155_v48 }
 0x2ff   :  { %vm1188_vm3 = vcmp.gt.f32.partialorder %v1156_v32, 0.0  ;;  %v1220_v17 = vmul.f32 0.1, %v1156_v32  ;;  %v1221_v16 = vmul.f32 0.1, %v1157_v61  ;;  %vm1189_vm4 = vcmp.gt.f32.partialorder %v1157_v61, 0.0 }
 0x300   :  { %v1250_v57 = vsel %vm1186_vm1, %v1154_v35, %v1218_v36  ;;  %v1251_v2 = vsel %vm1187_vm2, %v1155_v48, %v1219_v28  ;;  %v1222_v50 = vmul.f32 0.1, %v1158_v62  ;;  %vm1190_vm5 = vcmp.gt.f32.partialorder %v1158_v62, 0.0 }
 0x301   :  { %1895 = vmatprep.mubr.f32.mxu0 %v1250_v57  ;;  %v1252_v14 = vsel %vm1188_vm3, %v1156_v32, %v1220_v17  ;;  %v1124_v22 = vmul.f32 %v3006_v55, %v2861_v1  ;;  %v1125_v51 = vmul.f32 %v3006_v55, %v2867_v12  ;;  %v1253_v25 = vsel %vm1189_vm4, %v1157_v61, %v1221_v16 }
 0x302   :  { %1896 = vmatmul.mubr.f32.vlgmr.msra.gmra.mxu0 %v1251_v2  ;;  %v1223_v54 = vmul.f32 0.1, %v1159_v47  ;;  %v1161_v37 = vadd.f32 %v3017_v19, %v1122_v38  ;;  %v1254_v3 = vsel %vm1190_vm5, %v1158_v62, %v1222_v50  ;;  %vm1191_vm6 = vcmp.gt.f32.partialorder %v1159_v47, 0.0 }
 0x303   :  { %1898 = vmatprep.mubr.f32.mxu0 %v1252_v14  ;;  %v1224_v56 = vmul.f32 0.1, %v1160_v45  ;;  %v1162_v18 = vadd.f32 %v3017_v19, %v1123_v49  ;;  %vm1192_vm7 = vcmp.gt.f32.partialorder %v1160_v45, 0.0  ;;  %v1126_v44 = vmul.f32 %v3006_v55, %v2873_v33 }
 0x304   :  { %v1127_v1 = vmul.f32 %v3006_v55, %v2879_v11  ;;  %v1255_v23 = vsel %vm1191_vm6, %v1159_v47, %v1223_v54  ;;  %v1225_v12 = vmul.f32 0.1, %v1161_v37  ;;  %v1163_v31 = vadd.f32 %v3017_v19, %v1124_v22 }
 0x305   :  { %v1256_v7 = vsel %vm1192_vm7, %v1160_v45, %v1224_v56  ;;  %vm1193_vm8 = vcmp.gt.f32.partialorder %v1161_v37, 0.0  ;;  %v1226_v24 = vmul.f32 0.1, %v1162_v18  ;;  %v1164_v9 = vadd.f32 %v3017_v19, %v1125_v51 }
 0x306   :  { %1899 = vmatmul.mubr.f32.gmra.mxu0 %v1253_v25  ;;  %vm1194_vm9 = vcmp.gt.f32.partialorder %v1162_v18, 0.0  ;;  %v1128_v29 = vmul.f32 %v3006_v55, %v2885_v26  ;;  %v1129_v33 = vmul.f32 %v3006_v55, %v2891_v63  ;;  %v1257_v27 = vsel %vm1193_vm8, %v1161_v37, %v1225_v12 }
 0x307   :  { %1901 = vmatprep.mubr.f32.mxu0 %v1254_v3  ;;  %v1227_v11 = vmul.f32 0.1, %v1163_v31  ;;  %v1165_v21 = vadd.f32 %v3017_v19, %v1126_v44  ;;  %v1258_v13 = vsel %vm1194_vm9, %v1162_v18, %v1226_v24  ;;  %vm1195_vm10 = vcmp.gt.f32.partialorder %v1163_v31, 0.0 }
 0x308   :  { %v1228_v59 = vmul.f32 0.1, %v1164_v9  ;;  %v1166_v41 = vadd.f32 %v3017_v19, %v1127_v1  ;;  %vm1196_vm11 = vcmp.gt.f32.partialorder %v1164_v9, 0.0  ;;  %v1130_v48 = vmul.f32 %v3006_v55, %v2897_v58 }
 0x309   :  { %v1131_v26 = vmul.f32 %v3006_v55, %v2903_v4  ;;  %v1259_v35 = vsel %vm1195_vm10, %v1163_v31, %v1227_v11  ;;  %v1229_v63 = vmul.f32 0.1, %v1165_v21  ;;  %v1167_v32 = vadd.f32 %v3017_v19, %v1128_v29 }
 0x30a   :  { %1902 = vmatmul.mubr.f32.gmra.mxu0 %v1255_v23  ;;  %v1260_v40 = vsel %vm1196_vm11, %v1164_v9, %v1228_v59  ;;  %vm1197_vm12 = vcmp.gt.f32.partialorder %v1165_v21, 0.0  ;;  %v1230_v6 = vmul.f32 0.1, %v1166_v41  ;;  %v1168_v61 = vadd.f32 %v3017_v19, %v1129_v33 }
 0x30b   :  { %1904 = vmatprep.mubr.f32.mxu0 %v1256_v7  ;;  %vm1198_vm13 = vcmp.gt.f32.partialorder %v1166_v41, 0.0  ;;  %v1132_v62 = vmul.f32 %v3006_v55, %v2909_v20  ;;  %v1133_v58 = vmul.f32 %v3006_v55, %v2915_v42  ;;  %v1261_v36 = vsel %vm1197_vm12, %v1165_v21, %v1229_v63 }
 0x30c   :  { %v1231_v4 = vmul.f32 0.1, %v1167_v32  ;;  %v1169_v28 = vadd.f32 %v3017_v19, %v1130_v48  ;;  %v1262_v17 = vsel %vm1198_vm13, %v1166_v41, %v1230_v6  ;;  %vm1199_vm14 = vcmp.gt.f32.partialorder %v1167_v32, 0.0 }
 0x30d   :  { %v1232_v57 = vmul.f32 0.1, %v1168_v61  ;;  %v1170_v2 = vadd.f32 %v3017_v19, %v1131_v26  ;;  %vm1200_vm15 = vcmp.gt.f32.partialorder %v1168_v61, 0.0  ;;  %v1134_v38 = vmul.f32 %v3006_v55, %v2921_v0 }
 0x30e   :  { %1905 = vmatmul.mubr.f32.gmra.mxu0 %v1257_v27  ;;  %v1135_v20 = vmul.f32 %v3006_v55, %v2927_v43  ;;  %v1263_v49 = vsel %vm1199_vm14, %v1167_v32, %v1231_v4  ;;  %v1233_v42 = vmul.f32 0.1, %v1169_v28  ;;  %v1171_v16 = vadd.f32 %v3017_v19, %v1132_v62 }
 0x30f   :  { %1907 = vmatprep.mubr.f32.mxu0 %v1258_v13  ;;  %v1264_v47 = vsel %vm1200_vm15, %v1168_v61, %v1232_v57  ;;  %vm1201_vm0 = vcmp.gt.f32.partialorder %v1169_v28, 0.0  ;;  %v1234_v14 = vmul.f32 0.1, %v1170_v2  ;;  %v1172_v50 = vadd.f32 %v3017_v19, %v1133_v58 }
 0x310   :  { %vm1202_vm1 = vcmp.gt.f32.partialorder %v1170_v2, 0.0  ;;  %v1136_v45 = vmul.f32 %v3006_v55, %v2933_v46  ;;  %v1137_v0 = vmul.f32 %v3006_v55, %v2939_v39  ;;  %v1265_v22 = vsel %vm1201_vm0, %v1169_v28, %v1233_v42 }
 0x311   :  { %v1235_v43 = vmul.f32 0.1, %v1171_v16  ;;  %v1173_v51 = vadd.f32 %v3017_v19, %v1134_v38  ;;  %v1266_v25 = vsel %vm1202_vm1, %v1170_v2, %v1234_v14  ;;  %vm1203_vm2 = vcmp.gt.f32.partialorder %v1171_v16, 0.0 }
 0x312   :  { %1908 = vmatmul.mubr.f32.gmra.mxu0 %v1259_v35  ;;  %v1236_v54 = vmul.f32 0.1, %v1172_v50  ;;  %v1174_v37 = vadd.f32 %v3017_v19, %v1135_v20  ;;  %vm1204_vm3 = vcmp.gt.f32.partialorder %v1172_v50, 0.0  ;;  %v1138_v3 = vmul.f32 %v3006_v55, %v2945_v10  ;;  %v3112_v20 = vld [vmem:[%s3284_s10] ss:$0 sm:$0xff] }
 0x313   :  { %1910 = vmatprep.mubr.f32.mxu0 %v1260_v40  ;;  %v1139_v46 = vmul.f32 %v3006_v55, %v2951_v5  ;;  %v1267_v56 = vsel %vm1203_vm2, %v1171_v16, %v1235_v43  ;;  %v1237_v39 = vmul.f32 0.1, %v1173_v51  ;;  %v1175_v18 = vadd.f32 %v3017_v19, %v1136_v45 }
 0x314   :  { %v1268_v44 = vsel %vm1204_vm3, %v1172_v50, %v1236_v54  ;;  %vm1205_vm4 = vcmp.gt.f32.partialorder %v1173_v51, 0.0  ;;  %v1238_v1 = vmul.f32 0.1, %v1174_v37  ;;  %v1176_v23 = vadd.f32 %v3017_v19, %v1137_v0 }
 0x315   :  { %vm1206_vm5 = vcmp.gt.f32.partialorder %v1174_v37, 0.0  ;;  %v1140_v12 = vmul.f32 %v3006_v55, %v2957_v53  ;;  %v1141_v10 = vmul.f32 %v3006_v55, %v2963_v15  ;;  %v1269_v31 = vsel %vm1205_vm4, %v1173_v51, %v1237_v39 }
 0x316   :  { %1911 = vmatmul.mubr.f32.gmra.mxu0 %v1261_v36  ;;  %v1239_v5 = vmul.f32 0.1, %v1175_v18  ;;  %v1177_v7 = vadd.f32 %v3017_v19, %v1138_v3  ;;  %v1270_v24 = vsel %vm1206_vm5, %v1174_v37, %v1238_v1  ;;  %vm1207_vm6 = vcmp.gt.f32.partialorder %v1175_v18, 0.0 }
 0x317   :  { %1913 = vmatprep.mubr.f32.mxu0 %v1262_v17  ;;  %v1240_v9 = vmul.f32 0.1, %v1176_v23  ;;  %v1178_v29 = vadd.f32 %v3017_v19, %v1139_v46  ;;  %vm1208_vm7 = vcmp.gt.f32.partialorder %v1176_v23, 0.0  ;;  %v1142_v33 = vmul.f32 %v3006_v55, %v2969_v60 }
 0x318   :  { %v1143_v53 = vmul.f32 %v3006_v55, %v2975_v52  ;;  %v1271_v27 = vsel %vm1207_vm6, %v1175_v18, %v1239_v5  ;;  %v1241_v15 = vmul.f32 0.1, %v1177_v7  ;;  %v1179_v11 = vadd.f32 %v3017_v19, %v1140_v12 }
 0x319   :  { %v1272_v21 = vsel %vm1208_vm7, %v1176_v23, %v1240_v9  ;;  %vm1209_vm8 = vcmp.gt.f32.partialorder %v1177_v7, 0.0  ;;  %v1242_v13 = vmul.f32 0.1, %v1178_v29  ;;  %v1180_v59 = vadd.f32 %v3017_v19, %v1141_v10 }
 0x31a   :  { %1914 = vmatmul.mubr.f32.gmra.mxu0 %v1263_v49  ;;  %vm1210_vm9 = vcmp.gt.f32.partialorder %v1178_v29, 0.0  ;;  %v1145_v41 = vmul.f32 %v3006_v55, %v2987_v8  ;;  %v1144_v60 = vmul.f32 %v3006_v55, %v2981_v34  ;;  %v1273_v48 = vsel %vm1209_vm8, %v1177_v7, %v1241_v15 }
 0x31b   :  { %1916 = vmatprep.mubr.f32.mxu0 %v1264_v47  ;;  %v1243_v52 = vmul.f32 0.1, %v1179_v11  ;;  %v1181_v26 = vadd.f32 %v3017_v19, %v1142_v33  ;;  %v1274_v35 = vsel %vm1210_vm9, %v1178_v29, %v1242_v13  ;;  %vm1211_vm10 = vcmp.gt.f32.partialorder %v1179_v11, 0.0 }
 0x31c   :  { %v1244_v63 = vmul.f32 0.1, %v1180_v59  ;;  %v1182_v32 = vadd.f32 %v3017_v19, %v1143_v53  ;;  %vm1212_vm11 = vcmp.gt.f32.partialorder %v1180_v59, 0.0  ;;  %v1146_v40 = vmul.f32 %v3006_v55, %v2993_v30 }
 0x31d   :  { %v1275_v6 = vsel %vm1211_vm10, %v1179_v11, %v1243_v52  ;;  %v1245_v8 = vmul.f32 0.1, %v1181_v26  ;;  %v1183_v61 = vadd.f32 %v3017_v19, %v1144_v60  ;;  %vm1213_vm12 = vcmp.gt.f32.partialorder %v1181_v26, 0.0 }
 0x31e   :  { %1917 = vmatmul.mubr.f32.gmra.mxu0 %v1265_v22  ;;  %v1276_v34 = vsel %vm1212_vm11, %v1180_v59, %v1244_v63  ;;  %v1246_v62 = vmul.f32 0.1, %v1182_v32  ;;  %v1184_v58 = vadd.f32 %v3017_v19, %v1145_v41  ;;  %vm1214_vm13 = vcmp.gt.f32.partialorder %v1182_v32, 0.0 }
 0x31f   :  { %1919 = vmatprep.mubr.f32.mxu0 %v1266_v25  ;;  %v1277_v36 = vsel %vm1213_vm12, %v1181_v26, %v1245_v8  ;;  %v1247_v4 = vmul.f32 0.1, %v1183_v61  ;;  %v1185_v28 = vadd.f32 %v3017_v19, %v1146_v40  ;;  %vm1215_vm14 = vcmp.gt.f32.partialorder %v1183_v61, 0.0 }
 0x320   :  { %v1278_v17 = vsel %vm1214_vm13, %v1182_v32, %v1246_v62  ;;  %v1248_v30 = vmul.f32 0.1, %v1184_v58  ;;  %vm1216_vm15 = vcmp.gt.f32.partialorder %v1184_v58, 0.0  ;;  %vm1530_vm1 = vcmask 97280  }
 0x321   :  { %v1279_v55 = vsel %vm1215_vm14, %v1183_v61, %v1247_v4  ;;  %v1249_v57 = vmul.f32 0.1, %v1185_v28  ;;  %vm1217_vm0 = vcmp.gt.f32.partialorder %v1185_v28, 0.0 }
 0x322   :  { %1920 = vmatmul.mubr.f32.gmra.mxu0 %v1267_v56  ;;  %v1280_v2 = vsel %vm1216_vm15, %v1184_v58, %v1248_v30 }
 0x323   :  { %1922 = vmatprep.mubr.f32.mxu0 %v1268_v44  ;;  %v1281_v38 = vsel %vm1217_vm0, %v1185_v28, %v1249_v57 }
 0x326   :  { %1923 = vmatmul.mubr.f32.gmra.mxu0 %v1269_v31 }
 0x327   :  { %1925 = vmatprep.mubr.f32.mxu0 %v1270_v24 }
 0x32a   :  { %1926 = vmatmul.mubr.f32.gmra.mxu0 %v1271_v27 }
 0x32b   :  { %1928 = vmatprep.mubr.f32.mxu0 %v1272_v21 }
 0x32e   :  { %1929 = vmatmul.mubr.f32.gmra.mxu0 %v1273_v48 }
 0x32f   :  { %1931 = vmatprep.mubr.f32.mxu0 %v1274_v35 }
 0x332   :  { %1932 = vmatmul.mubr.f32.gmra.mxu0 %v1275_v6 }
 0x333   :  { %1934 = vmatprep.mubr.f32.mxu0 %v1276_v34 }
 0x336   :  { %1935 = vmatmul.mubr.f32.gmra.mxu0 %v1277_v36 }
 0x337   :  { %1937 = vmatprep.mubr.f32.mxu0 %v1278_v17 }
 0x33a   :  { %1938 = vmatmul.mubr.f32.gmra.mxu0 %v1279_v55 }
 0x33b   :  { %1940 = vmatprep.mubr.f32.mxu0 %v1280_v2 }
 0x33e   :  { %1941 = vmatmul.mubr.f32.gmra.mxu0 %v1281_v38 }
 0x3c2   :  { %v1897_v19 = vpop.f32.mrf.mxu0 }
 0x3c3   :  { %v1377_v49 = vadd.f32 %v1897_v19, %v3112_v20 }
 0x3c4   :  { %v1371_v42 = vpop.f32.mrf.mxu0 }
 0x3c5   :  { %1532 = vst.msk [vmem:[%s3285_s11 + $0x8] sm:$0xff] %vm1530_vm1, %v1377_v49  ;;  %v1372_v16 = vadd.f32 %v3112_v20, %v1371_v42 }
 0x3c6   :  { %v1900_v47 = vpop.f32.mrf.mxu0 }
 0x3c7   :  { %1531 = vst.msk [vmem:[%s3285_s11] sm:$0xff] %vm1530_vm1, %v1372_v16  ;;  %v1387_v14 = vadd.f32 %v1900_v47, %v3112_v20 }
 0x3c8   :  { %v1381_v50 = vpop.f32.mrf.mxu0 }
 0x3c9   :  { %1534 = vst.msk [vmem:[%s3285_s11 + $0x18] sm:$0xff] %vm1530_vm1, %v1387_v14  ;;  %v1382_v45 = vadd.f32 %v3112_v20, %v1381_v50 }
 0x3ca   :  { %v1903_v0 = vpop.f32.mrf.mxu0 }
 0x3cb   :  { %1533 = vst.msk [vmem:[%s3285_s11 + $0x10] sm:$0xff] %vm1530_vm1, %v1382_v45  ;;  %v1397_v22 = vadd.f32 %v1903_v0, %v3112_v20 }
 0x3cc   :  { %v1391_v43 = vpop.f32.mrf.mxu0 }
 0x3cd   :  { %1536 = vst.msk [vmem:[%s3285_s11 + $0x28] sm:$0xff] %vm1530_vm1, %v1397_v22  ;;  %v1392_v51 = vadd.f32 %v3112_v20, %v1391_v43 }
 0x3ce   :  { %v1906_v25 = vpop.f32.mrf.mxu0 }
 0x3cf   :  { %1535 = vst.msk [vmem:[%s3285_s11 + $0x20] sm:$0xff] %vm1530_vm1, %v1392_v51  ;;  %v1407_v54 = vadd.f32 %v1906_v25, %v3112_v20 }
 0x3d0   :  { %v1401_v37 = vpop.f32.mrf.mxu0 }
 0x3d1   :  { %1538 = vst.msk [vmem:[%s3285_s11 + $0x38] sm:$0xff] %vm1530_vm1, %v1407_v54  ;;  %v1402_v3 = vadd.f32 %v3112_v20, %v1401_v37 }
 0x3d2   :  { %v1909_v46 = vpop.f32.mrf.mxu0 }
 0x3d3   :  { %1537 = vst.msk [vmem:[%s3285_s11 + $0x30] sm:$0xff] %vm1530_vm1, %v1402_v3  ;;  %v1417_v56 = vadd.f32 %v1909_v46, %v3112_v20 }
 0x3d4   :  { %v1411_v39 = vpop.f32.mrf.mxu0 }
 0x3d5   :  { %1540 = vst.msk [vmem:[%s3285_s11 + $0x48] sm:$0xff] %vm1530_vm1, %v1417_v56  ;;  %v1412_v18 = vadd.f32 %v3112_v20, %v1411_v39 }
 0x3d6   :  { %v1912_v44 = vpop.f32.mrf.mxu0 }
 0x3d7   :  { %1539 = vst.msk [vmem:[%s3285_s11 + $0x40] sm:$0xff] %vm1530_vm1, %v1412_v18  ;;  %v1427_v1 = vadd.f32 %v1912_v44, %v3112_v20 }
 0x3d8   :  { %v1421_v23 = vpop.f32.mrf.mxu0 }
 0x3d9   :  { %1542 = vst.msk [vmem:[%s3285_s11 + $0x58] sm:$0xff] %vm1530_vm1, %v1427_v1  ;;  %v1422_v12 = vadd.f32 %v3112_v20, %v1421_v23 }
 0x3da   :  { %v1915_v10 = vpop.f32.mrf.mxu0 }
 0x3db   :  { %1541 = vst.msk [vmem:[%s3285_s11 + $0x50] sm:$0xff] %vm1530_vm1, %v1422_v12  ;;  %v1437_v31 = vadd.f32 %v1915_v10, %v3112_v20 }
 0x3dc   :  { %v1431_v5 = vpop.f32.mrf.mxu0 }
 0x3dd   :  { %1544 = vst.msk [vmem:[%s3285_s11 + $0x68] sm:$0xff] %vm1530_vm1, %v1437_v31  ;;  %v1432_v7 = vadd.f32 %v3112_v20, %v1431_v5 }
 0x3de   :  { %v1918_v24 = vpop.f32.mrf.mxu0 }
 0x3df   :  { %1543 = vst.msk [vmem:[%s3285_s11 + $0x60] sm:$0xff] %vm1530_vm1, %v1432_v7  ;;  %v1447_v9 = vadd.f32 %v1918_v24, %v3112_v20 }
 0x3e0   :  { %v1441_v29 = vpop.f32.mrf.mxu0 }
 0x3e1   :  { %1546 = vst.msk [vmem:[%s3285_s11 + $0x78] sm:$0xff] %vm1530_vm1, %v1447_v9  ;;  %v1442_v33 = vadd.f32 %v3112_v20, %v1441_v29 }
 0x3e2   :  { %v1921_v53 = vpop.f32.mrf.mxu0 }
 0x3e3   :  { %1545 = vst.msk [vmem:[%s3285_s11 + $0x70] sm:$0xff] %vm1530_vm1, %v1442_v33  ;;  %v1457_v27 = vadd.f32 %v1921_v53, %v3112_v20 }
 0x3e4   :  { %v1451_v15 = vpop.f32.mrf.mxu0 }
 0x3e5   :  { %1548 = vst.msk [vmem:[%s3285_s11 + $0x88] sm:$0xff] %vm1530_vm1, %v1457_v27  ;;  %v1452_v11 = vadd.f32 %v3112_v20, %v1451_v15 }
 0x3e6   :  { %v1924_v21 = vpop.f32.mrf.mxu0 }
 0x3e7   :  { %1547 = vst.msk [vmem:[%s3285_s11 + $0x80] sm:$0xff] %vm1530_vm1, %v1452_v11  ;;  %v1467_v13 = vadd.f32 %v1924_v21, %v3112_v20 }
 0x3e8   :  { %v1461_v59 = vpop.f32.mrf.mxu0 }
 0x3e9   :  { %1550 = vst.msk [vmem:[%s3285_s11 + $0x98] sm:$0xff] %vm1530_vm1, %v1467_v13  ;;  %v1462_v41 = vadd.f32 %v3112_v20, %v1461_v59 }
 0x3ea   :  { %v1927_v60 = vpop.f32.mrf.mxu0 }
 0x3eb   :  { %1549 = vst.msk [vmem:[%s3285_s11 + $0x90] sm:$0xff] %vm1530_vm1, %v1462_v41  ;;  %v1477_v48 = vadd.f32 %v1927_v60, %v3112_v20 }
 0x3ec   :  { %v1471_v52 = vpop.f32.mrf.mxu0 }
 0x3ed   :  { %1552 = vst.msk [vmem:[%s3285_s11 + $0xa8] sm:$0xff] %vm1530_vm1, %v1477_v48  ;;  %v1472_v26 = vadd.f32 %v3112_v20, %v1471_v52 }
 0x3ee   :  { %v1930_v35 = vpop.f32.mrf.mxu0 }
 0x3ef   :  { %1551 = vst.msk [vmem:[%s3285_s11 + $0xa0] sm:$0xff] %vm1530_vm1, %v1472_v26  ;;  %v1487_v63 = vadd.f32 %v1930_v35, %v3112_v20 }
 0x3f0   :  { %v1481_v32 = vpop.f32.mrf.mxu0 }
 0x3f1   :  { %1554 = vst.msk [vmem:[%s3285_s11 + $0xb8] sm:$0xff] %vm1530_vm1, %v1487_v63  ;;  %v1482_v40 = vadd.f32 %v3112_v20, %v1481_v32 }
 0x3f2   :  { %v1933_v6 = vpop.f32.mrf.mxu0 }
 0x3f3   :  { %1553 = vst.msk [vmem:[%s3285_s11 + $0xb0] sm:$0xff] %vm1530_vm1, %v1482_v40  ;;  %v1497_v8 = vadd.f32 %v1933_v6, %v3112_v20 }
 0x3f4   :  { %v1491_v61 = vpop.f32.mrf.mxu0 }
 0x3f5   :  { %1556 = vst.msk [vmem:[%s3285_s11 + $0xc8] sm:$0xff] %vm1530_vm1, %v1497_v8  ;;  %v1492_v34 = vadd.f32 %v3112_v20, %v1491_v61 }
 0x3f6   :  { %v1936_v62 = vpop.f32.mrf.mxu0 }
 0x3f7   :  { %1555 = vst.msk [vmem:[%s3285_s11 + $0xc0] sm:$0xff] %vm1530_vm1, %v1492_v34  ;;  %v1507_v58 = vadd.f32 %v1936_v62, %v3112_v20 }
 0x3f8   :  { %v1501_v36 = vpop.f32.mrf.mxu0 }
 0x3f9   :  { %1558 = vst.msk [vmem:[%s3285_s11 + $0xd8] sm:$0xff] %vm1530_vm1, %v1507_v58  ;;  %v1502_v4 = vadd.f32 %v3112_v20, %v1501_v36 }
 0x3fa   :  { %v1939_v28 = vpop.f32.mrf.mxu0 }
 0x3fb   :  { %1557 = vst.msk [vmem:[%s3285_s11 + $0xd0] sm:$0xff] %vm1530_vm1, %v1502_v4  ;;  %v1517_v17 = vadd.f32 %v1939_v28, %v3112_v20 }
 0x3fc   :  { %v1511_v30 = vpop.f32.mrf.mxu0 }
 0x3fd   :  { %1560 = vst.msk [vmem:[%s3285_s11 + $0xe8] sm:$0xff] %vm1530_vm1, %v1517_v17  ;;  %v1512_v55 = vadd.f32 %v3112_v20, %v1511_v30 }
 0x3fe   :  { %v1942_v57 = vpop.f32.mrf.mxu0 }
 0x3ff   :  { %1559 = vst.msk [vmem:[%s3285_s11 + $0xe0] sm:$0xff] %vm1530_vm1, %v1512_v55  ;;  %v1527_v2 = vadd.f32 %v1942_v57, %v3112_v20 }
 0x400   :  { %v1521_v38 = vpop.f32.mrf.mxu0 }
 0x401   :  { %1562 = vst.msk [vmem:[%s3285_s11 + $0xf8] sm:$0xff] %vm1530_vm1, %v1527_v2  ;;  %v1522_v19 = vadd.f32 %v3112_v20, %v1521_v38 }
 0x403   :  { %1561 = vst.msk [vmem:[%s3285_s11 + $0xf0] sm:$0xff] %vm1530_vm1, %v1522_v19 }

</bundles_post_ra>
